<compile_context>
chip_gen: v7x
topology: tpu7x:2x2x1
jax: 0.10.0
libtpu: 0.0.40
codegen_flags: <defaults>
</compile_context>

<pallas_src>
import functools

import jax
import jax.numpy as jnp
from jax.experimental import pallas as pl
from jax.experimental.pallas import tpu as pltpu


def _round_up(x, m):
    return -(-x // m) * m


# ----------------------------------------------------------------------------
# Fused kernel: conv1(1x1,s2) -> conv2(3x3,p1) -> conv3(1x1) + shortcut + ReLU
# ----------------------------------------------------------------------------
def _fused_block_kernel(xt_ref, xm_ref, xb_ref,
                        w1_ref, b1_ref, w2_ref, b2_ref,
                        w3_ref, b3_ref, wd_ref, bd_ref,
                        o_ref, xall_ref, h1_ref,
                        *, TH, Ws, Wp, C1, C2, C3, C4):
    # xt/xb: (1, 1, Ws, C1) halo rows; xm: (1, TH, Ws, C1) main rows (already
    # stride-2 subsampled).  xall_ref: (TH+2, Ws, C1) staged conv1 input.
    # h1_ref: (TH+2, Wp, C2) zero-padded conv1 output (bf16).
    t = pl.program_id(1)
    num_t = pl.num_programs(1)
    M2 = TH * Wp
    f32 = jnp.float32
    bf16 = jnp.bfloat16

    # ---- conv1 (1x1; stride 2 already applied by the wrapper) + BN + ReLU ---
    # Stage halo + main rows into one buffer -> ONE matmul over (TH+2)*Ws rows
    # (replaces three separate matmuls / bias / ReLU / store passes).
    xall_ref[0:1] = xt_ref[0]
    xall_ref[1:TH + 1] = xm_ref[0]
    xall_ref[TH + 1:TH + 2] = xb_ref[0]
    x_all = xall_ref[...].reshape((TH + 2) * Ws, C1)            # bf16 operand
    y1 = jnp.dot(x_all, w1_ref[...], preferred_element_type=f32)
    h1_mid = jnp.maximum(y1 + b1_ref[...], 0.0).astype(bf16)
    h1_ref[:, 1:Ws + 1, :] = h1_mid.reshape(TH + 2, Ws, C2)

    # zero the 3x3 W-pad columns (col 0 and cols Ws+1..Wp-1).  Written every
    # step so each grid step is fully self-contained (safe under "parallel").
    h1_ref[:, 0:1, :] = jnp.zeros((TH + 2, 1, C2), bf16)
    h1_ref[:, Ws + 1:Wp, :] = jnp.zeros((TH + 2, Wp - Ws - 1, C2), bf16)

    # zero the 3x3 H-pad rows at the image boundary.
    @pl.when(t == 0)
    def _():
        h1_ref[0:1, :, :] = jnp.zeros((1, Wp, C2), bf16)

    @pl.when(t == num_t - 1)
    def _():
        h1_ref[TH + 1:TH + 2, :, :] = jnp.zeros((1, Wp, C2), bf16)

    # ---- conv2 (3x3, pad 1) + BN + ReLU -------------------------------------
    # Matmul whole contiguous row-slabs of the padded h1 scratch.  The dx tap
    # offset is handled with per-dx accumulators and only TWO row-shifts of the
    # lane-dense (C3-on-lanes) partial sums.  Wrapped rows land only in the
    # >= 2 discarded trailing pad columns.
    h1 = h1_ref[...]                                            # bf16 operand
    acc0 = jnp.zeros((M2, C3), f32)
    acc1 = jnp.zeros((M2, C3), f32)
    acc2 = jnp.zeros((M2, C3), f32)
    for dy in range(3):                                         # unrolled
        slab = h1[dy:dy + TH].reshape(M2, C2)
        acc0 = acc0 + jnp.dot(slab, w2_ref[dy, 0], preferred_element_type=f32)
        acc1 = acc1 + jnp.dot(slab, w2_ref[dy, 1], preferred_element_type=f32)
        acc2 = acc2 + jnp.dot(slab, w2_ref[dy, 2], preferred_element_type=f32)
    # TODO(synk): jnp.roll kept (known-correct shift direction); pltpu.roll
    #             would guarantee XLU lowering for these two row-shifts.
    acc = acc0 + jnp.roll(acc1, -1, axis=0) + jnp.roll(acc2, -2, axis=0)
    h2 = jnp.maximum(acc + b2_ref[...], 0.0).astype(bf16)

    # ---- conv3 (1x1) + shortcut (1x1 stride-2) + residual + ReLU ------------
    # conv3 runs on the full padded width (big M, no pre-matmul slice); the
    # W-slice / residual add / ReLU happen on the 3D value at the store.
    y3 = jnp.dot(h2, w3_ref[...], preferred_element_type=f32)
    y3 = y3.reshape(TH, Wp, C4)[:, :Ws, :]
    sc = jnp.dot(xm_ref[0].reshape(TH * Ws, C1), wd_ref[...],
                 preferred_element_type=f32).reshape(TH, Ws, C4)
    out = jnp.maximum(y3 + b3_ref[...] + sc + bd_ref[...], 0.0)
    o_ref[0] = out.astype(o_ref.dtype)


# ----------------------------------------------------------------------------
# Tiling: derive the row-tile height from a VMEM budget
# ----------------------------------------------------------------------------
def _estimate_vmem_bytes(th, ws, wp, c1, c2, c3, c4, out_bytes):
    m2 = th * wp
    rows = (th + 2) * ws
    weights = 2 * (2 * (c1 * c2 + 9 * c2 * c3 + c3 * c4 + c1 * c4)
                   + 4 * (c2 + c3 + 2 * c4))           # consts, double-buffered
    blocks = (2 * 2 * (th + 2) * ws * c1               # bf16 input blocks x2buf
              + 2 * out_bytes * th * ws * c4)          # output block x2buf
    scratch = 2 * rows * c1 + 2 * (th + 2) * wp * c2   # x_all + h1 (bf16)
    temps = (4 * rows * c2 + 2 * rows * c2             # conv1 f32 out + bf16
             + 4 * 4 * m2 * c3                         # acc0..2 + combined f32
             + 2 * m2 * c3 + 4 * m2 * c4               # h2 bf16, y3 f32
             + 4 * 2 * th * ws * c4)                   # shortcut + out f32
    return weights + blocks + scratch + temps


def _pick_tile_rows(hs, n_batch, ws, wp, c1, c2, c3, c4, out_bytes,
                    max_rows, budget_bytes):
    best = 1
    for th in range(1, min(hs, max_rows) + 1):
        if hs % th:
            continue
        if n_batch == 1 and hs > 1 and th == hs:
            continue      # keep >= 2 grid steps so v7x's 2 TCs both get work
        if _estimate_vmem_bytes(th, ws, wp, c1, c2, c3, c4,
                                out_bytes) <= budget_bytes:
            best = th
    return best


# ----------------------------------------------------------------------------
# Full block forward
# ----------------------------------------------------------------------------
def downsampling_block(x_nchw, p, *, max_tile_rows=64, vmem_budget_bytes=26 << 20):
    x = jnp.transpose(x_nchw, (0, 2, 3, 1))             # NCHW -> NHWC
    # 1x1 conv with stride 2, padding 0 == spatial subsample.  The transpose,
    # the strided slice and the bf16 cast fuse into one XLA copy pass.
    xs = x[:, ::2, ::2, :].astype(jnp.bfloat16)
    N, Hs, Ws, C1 = xs.shape
    C2 = p["w1"].shape[1]
    C3 = p["w2"].shape[-1]
    C4 = p["w3"].shape[1]
    out_dtype = x_nchw.dtype
    out_bytes = jnp.dtype(out_dtype).itemsize

    # Fold inference-BN scale into the conv weights (bf16 MXU operands, f32
    # accumulation); keep the BN shift as an f32 bias applied in-kernel.
    bf16 = jnp.bfloat16
    w1f = (p["w1"] * p["s1"]).astype(bf16)
    w2f = (p["w2"] * p["s2"].reshape(1, 1, 1, C3)).astype(bf16)
    w3f = (p["w3"] * p["s3"]).astype(bf16)
    wdf = (p["w_down"] * p["s_down"]).astype(bf16)
    b1, b2, b3, bd = p["b1"], p["b2"], p["b3"], p["b_down"]

    # Sublane-aligned padded scratch width: keeps the 3x3 row-slab flattens
    # layout-preserving (the >= 2 extra columns stay zero / discarded).
    Wp = _round_up(Ws + 2, 8)

    # Row-tile height from a VMEM budget (v7x-safe default), not a fixed const.
    TH = _pick_tile_rows(Hs, N, Ws, Wp, C1, C2, C3, C4, out_bytes,
                         max_tile_rows, vmem_budget_bytes)
    T = Hs // TH
    est = _estimate_vmem_bytes(TH, Ws, Wp, C1, C2, C3, C4, out_bytes)
    vmem_limit = None if est <= (12 << 20) else (48 << 20)

    kern = functools.partial(_fused_block_kernel, TH=TH, Ws=Ws, Wp=Wp,
                             C1=C1, C2=C2, C3=C3, C4=C4)

    def const(shape):
        return pl.BlockSpec(shape, lambda n, t: (0,) * len(shape))

    out = pl.pallas_call(
        kern,
        out_shape=jax.ShapeDtypeStruct((N, Hs, Ws, C4), out_dtype),
        grid=(N, T),
        in_specs=[
            # top halo row (clamped at the image boundary; replaced by the 3x3
            # zero-pad row inside the kernel when t == 0)
            pl.BlockSpec((1, 1, Ws, C1),
                         lambda n, t: (n, jnp.maximum(t * TH - 1, 0), 0, 0)),
            # main TH-row tile (already stride-2 subsampled)
            pl.BlockSpec((1, TH, Ws, C1), lambda n, t: (n, t, 0, 0)),
            # bottom halo row (clamped; zeroed in-kernel when t == T-1)
            pl.BlockSpec((1, 1, Ws, C1),
                         lambda n, t: (n, jnp.minimum(t * TH + TH, Hs - 1), 0, 0)),
            const(w1f.shape), const(b1.shape),
            const(w2f.shape), const(b2.shape),
            const(w3f.shape), const(b3.shape),
            const(wdf.shape), const(bd.shape),
        ],
        out_specs=pl.BlockSpec((1, TH, Ws, C4), lambda n, t: (n, t, 0, 0)),
        scratch_shapes=[
            pltpu.VMEM((TH + 2, Ws, C1), jnp.bfloat16),   # staged conv1 input
            pltpu.VMEM((TH + 2, Wp, C2), jnp.bfloat16),   # padded conv1 output
        ],
        compiler_params=pltpu.CompilerParams(
            dimension_semantics=("parallel", "parallel"),
            vmem_limit_bytes=vmem_limit),
    )(xs, xs, xs, w1f, b1, w2f, b2, w3f, b3, wdf, bd)

    return jnp.transpose(out, (0, 3, 1, 2))              # NHWC -> NCHW


# ----------------------------------------------------------------------------
# Deterministic parameter init (synthetic weights, folded inference BN)
# ----------------------------------------------------------------------------
def init_params(key, dim1, dim2, dim3, dim4):
    k = jax.random.split(key, 4)
    eps = 1e-5

    def bn_fold(c, phase):
        gamma = 1.0 + 0.1 * jnp.cos(jnp.arange(c, dtype=jnp.float32) + phase)
        beta = 0.05 * jnp.sin(jnp.arange(c, dtype=jnp.float32) + phase)
        # running_mean = 0, running_var = 1
        scale = gamma / jnp.sqrt(1.0 + eps)
        bias = beta
        return scale.reshape(1, c), bias.reshape(1, c)

    p = {
        "w_down": 0.1 * jax.random.normal(k[0], (dim1, dim4), jnp.float32),
        "w1":     0.1 * jax.random.normal(k[1], (dim1, dim2), jnp.float32),
        "w2":     0.1 * jax.random.normal(k[2], (3, 3, dim2, dim3), jnp.float32),
        "w3":     0.1 * jax.random.normal(k[3], (dim3, dim4), jnp.float32),
    }
    p["s_down"], p["b_down"] = bn_fold(dim4, 0.0)
    p["s1"], p["b1"] = bn_fold(dim2, 1.0)
    p["s2"], p["b2"] = bn_fold(dim3, 2.0)
    p["s3"], p["b3"] = bn_fold(dim4, 3.0)
    return p


# ----------------------------------------------------------------------------
# Pure-JAX reference (for correctness check only)
# ----------------------------------------------------------------------------
def reference(x_nchw, p):
    dn = ("NHWC", "HWIO", "NHWC")
    conv = lambda x, w, s, pad: jax.lax.conv_general_dilated(
        x, w, s, pad, dimension_numbers=dn)
    x = jnp.transpose(x_nchw, (0, 2, 3, 1))
    xd = conv(x, p["w_down"][None, None], (2, 2), "VALID") * p["s_down"][0] + p["b_down"][0]
    h = conv(x, p["w1"][None, None], (2, 2), "VALID") * p["s1"][0] + p["b1"][0]
    h = jnp.maximum(h, 0.0)
    h = conv(h, p["w2"], (1, 1), ((1, 1), (1, 1))) * p["s2"][0] + p["b2"][0]
    h = jnp.maximum(h, 0.0)
    h = conv(h, p["w3"][None, None], (1, 1), "VALID") * p["s3"][0] + p["b3"][0]
    out = jnp.maximum(h + xd, 0.0)
    return jnp.transpose(out, (0, 3, 1, 2))


if __name__ == "__main__":
    key = jax.random.PRNGKey(0)
    # (N, (dim1, dim2, dim3, dim4), H, W, max_tile_rows)
    cases = [
        (2, (4, 4, 4, 8), 16, 16, 16),     # toy dims, single row-tile
        (2, (8, 16, 16, 32), 32, 32, 4),   # multi-tile path: real halo rows,
                                           # boundary zero rows, roll wrap
    ]
    for (N, dims, H, W, max_rows) in cases:
        key, kx, kp = jax.random.split(key, 3)
        x = jax.random.normal(kx, (N, dims[0], H, W), jnp.float32)
        params = init_params(kp, *dims)
        fwd = jax.jit(functools.partial(downsampling_block,
                                        max_tile_rows=max_rows))
        out = jax.block_until_ready(fwd(x, params))
        ref = jax.block_until_ready(reference(x, params))
        assert out.shape == (N, dims[3], H // 2, W // 2), out.shape
        err = float(jnp.max(jnp.abs(out - ref)))
        # bf16 MXU operands with f32 accumulation -> relaxed tolerance.
        assert jnp.allclose(out, ref, atol=5e-2, rtol=5e-2), err
    print("KERNEL_OK")
</pallas_src>

<mosaic_0001>
module attributes {stable_mosaic.version = 11 : i64} {
  func.func @_fused_block_kernel(%arg0: i32, %arg1: i32, %arg2: memref<1x1x8x4xbf16, #tpu.memory_space<vmem>>, %arg3: memref<1x8x8x4xbf16, #tpu.memory_space<vmem>>, %arg4: memref<1x1x8x4xbf16, #tpu.memory_space<vmem>>, %arg5: memref<4x4xbf16, #tpu.memory_space<vmem>>, %arg6: memref<1x4xf32, #tpu.memory_space<vmem>>, %arg7: memref<3x3x4x4xbf16, #tpu.memory_space<vmem>>, %arg8: memref<1x4xf32, #tpu.memory_space<vmem>>, %arg9: memref<4x8xbf16, #tpu.memory_space<vmem>>, %arg10: memref<1x8xf32, #tpu.memory_space<vmem>>, %arg11: memref<4x8xbf16, #tpu.memory_space<vmem>>, %arg12: memref<1x8xf32, #tpu.memory_space<vmem>>, %arg13: memref<1x8x8x8xf32, #tpu.memory_space<vmem>>, %arg14: memref<10x8x4xbf16, #tpu.memory_space<vmem>>, %arg15: memref<10x16x4xbf16, #tpu.memory_space<vmem>>) attributes {dimension_semantics = [#tpu.dimension_semantics<parallel>, #tpu.dimension_semantics<parallel>], iteration_bounds = array<i64: 2, 1>, scalar_prefetch = 0 : i64, scratch_operands = 2 : i64, tpu.core_type = #tpu.core_type<tc>, window_params = [{transform_indices = @transform_0, window_bounds = array<i64: 1, 1, 8, 4>}, {transform_indices = @transform_1, window_bounds = array<i64: 1, 8, 8, 4>}, {transform_indices = @transform_2, window_bounds = array<i64: 1, 1, 8, 4>}, {pipeline_mode = #tpu.pipeline_mode<synchronous>, transform_indices = @transform_3, window_bounds = array<i64: 4, 4>}, {pipeline_mode = #tpu.pipeline_mode<synchronous>, transform_indices = @transform_4, window_bounds = array<i64: 1, 4>}, {pipeline_mode = #tpu.pipeline_mode<synchronous>, transform_indices = @transform_5, window_bounds = array<i64: 3, 3, 4, 4>}, {pipeline_mode = #tpu.pipeline_mode<synchronous>, transform_indices = @transform_6, window_bounds = array<i64: 1, 4>}, {pipeline_mode = #tpu.pipeline_mode<synchronous>, transform_indices = @transform_7, window_bounds = array<i64: 4, 8>}, {pipeline_mode = #tpu.pipeline_mode<synchronous>, transform_indices = @transform_8, window_bounds = array<i64: 1, 8>}, {pipeline_mode = #tpu.pipeline_mode<synchronous>, transform_indices = @transform_9, window_bounds = array<i64: 4, 8>}, {pipeline_mode = #tpu.pipeline_mode<synchronous>, transform_indices = @transform_10, window_bounds = array<i64: 1, 8>}, {transform_indices = @transform_11, window_bounds = array<i64: 1, 8, 8, 8>}]} {
    %c0 = arith.constant 0 : index
    %c0_0 = arith.constant 0 : index
    %c0_1 = arith.constant 0 : index
    %c0_2 = arith.constant 0 : index
    %0 = vector.load %arg2[%c0, %c0_0, %c0_1, %c0_2] : memref<1x1x8x4xbf16, #tpu.memory_space<vmem>>, vector<1x1x8x4xbf16>
    %1 = vector.shape_cast %0 : vector<1x1x8x4xbf16> to vector<1x8x4xbf16>
    %c0_3 = arith.constant 0 : index
    %c0_4 = arith.constant 0 : index
    %c0_5 = arith.constant 0 : index
    %2 = vector.load %arg14[%c0_3, %c0_4, %c0_5] : memref<10x8x4xbf16, #tpu.memory_space<vmem>>, vector<1x8x4xbf16>
    tpu.vector_store %arg14[%c0_3, %c0_4, %c0_5], %1 {strides = array<i32>} : memref<10x8x4xbf16, #tpu.memory_space<vmem>>, vector<1x8x4xbf16>,
    %c0_6 = arith.constant 0 : index
    %c0_7 = arith.constant 0 : index
    %c0_8 = arith.constant 0 : index
    %c0_9 = arith.constant 0 : index
    %3 = vector.load %arg3[%c0_6, %c0_7, %c0_8, %c0_9] : memref<1x8x8x4xbf16, #tpu.memory_space<vmem>>, vector<1x8x8x4xbf16>
    %4 = vector.shape_cast %3 : vector<1x8x8x4xbf16> to vector<8x8x4xbf16>
    %c1 = arith.constant 1 : index
    %c0_10 = arith.constant 0 : index
    %c0_11 = arith.constant 0 : index
    %5 = vector.load %arg14[%c1, %c0_10, %c0_11] : memref<10x8x4xbf16, #tpu.memory_space<vmem>>, vector<8x8x4xbf16>
    tpu.vector_store %arg14[%c1, %c0_10, %c0_11], %4 {strides = array<i32>} : memref<10x8x4xbf16, #tpu.memory_space<vmem>>, vector<8x8x4xbf16>,
    %c0_12 = arith.constant 0 : index
    %c0_13 = arith.constant 0 : index
    %c0_14 = arith.constant 0 : index
    %c0_15 = arith.constant 0 : index
    %6 = vector.load %arg4[%c0_12, %c0_13, %c0_14, %c0_15] : memref<1x1x8x4xbf16, #tpu.memory_space<vmem>>, vector<1x1x8x4xbf16>
    %7 = vector.shape_cast %6 : vector<1x1x8x4xbf16> to vector<1x8x4xbf16>
    %c9 = arith.constant 9 : index
    %c0_16 = arith.constant 0 : index
    %c0_17 = arith.constant 0 : index
    %8 = vector.load %arg14[%c9, %c0_16, %c0_17] : memref<10x8x4xbf16, #tpu.memory_space<vmem>>, vector<1x8x4xbf16>
    tpu.vector_store %arg14[%c9, %c0_16, %c0_17], %7 {strides = array<i32>} : memref<10x8x4xbf16, #tpu.memory_space<vmem>>, vector<1x8x4xbf16>,
    %c0_18 = arith.constant 0 : index
    %c0_19 = arith.constant 0 : index
    %c0_20 = arith.constant 0 : index
    %9 = vector.load %arg14[%c0_18, %c0_19, %c0_20] : memref<10x8x4xbf16, #tpu.memory_space<vmem>>, vector<10x8x4xbf16>
    %10 = vector.shape_cast %9 : vector<10x8x4xbf16> to vector<80x4xbf16>
    %c0_21 = arith.constant 0 : index
    %c0_22 = arith.constant 0 : index
    %11 = vector.load %arg5[%c0_21, %c0_22] : memref<4x4xbf16, #tpu.memory_space<vmem>>, vector<4x4xbf16>
    %cst = arith.constant dense<0.000000e+00> : vector<80x4xf32>
    %12 = tpu.matmul %10, %11, %cst {dimension_numbers = #tpu.dot_dimension_numbers<[1], [0], [0], [1], [0, 0, 1, 1], [], []>} : vector<80x4xbf16>, vector<4x4xbf16>, vector<80x4xf32> -> vector<80x4xf32>
    %c0_23 = arith.constant 0 : index
    %c0_24 = arith.constant 0 : index
    %13 = vector.load %arg6[%c0_23, %c0_24] : memref<1x4xf32, #tpu.memory_space<vmem>>, vector<1x4xf32>
    %14 = vector.broadcast %13 : vector<1x4xf32> to vector<80x4xf32>
    %15 = arith.addf %12, %14 : vector<80x4xf32>
    %cst_25 = arith.constant 0.000000e+00 : f32
    %16 = vector.broadcast %cst_25 : f32 to vector<80x4xf32>
    %17 = arith.maximumf %15, %16 : vector<80x4xf32>
    %18 = arith.truncf %17 : vector<80x4xf32> to vector<80x4xbf16>
    %19 = vector.shape_cast %18 : vector<80x4xbf16> to vector<10x8x4xbf16>
    %c0_26 = arith.constant 0 : index
    %c1_27 = arith.constant 1 : index
    %c0_28 = arith.constant 0 : index
    %20 = vector.load %arg15[%c0_26, %c1_27, %c0_28] : memref<10x16x4xbf16, #tpu.memory_space<vmem>>, vector<10x8x4xbf16>
    tpu.vector_store %arg15[%c0_26, %c1_27, %c0_28], %19 {strides = array<i32>} : memref<10x16x4xbf16, #tpu.memory_space<vmem>>, vector<10x8x4xbf16>,
    %cst_29 = arith.constant 0.000000e+00 : bf16
    %21 = vector.broadcast %cst_29 : bf16 to vector<10x1x4xbf16>
    %c0_30 = arith.constant 0 : index
    %c0_31 = arith.constant 0 : index
    %c0_32 = arith.constant 0 : index
    %22 = vector.load %arg15[%c0_30, %c0_31, %c0_32] : memref<10x16x4xbf16, #tpu.memory_space<vmem>>, vector<10x1x4xbf16>
    tpu.vector_store %arg15[%c0_30, %c0_31, %c0_32], %21 {strides = array<i32>} : memref<10x16x4xbf16, #tpu.memory_space<vmem>>, vector<10x1x4xbf16>,
    %cst_33 = arith.constant 0.000000e+00 : bf16
    %23 = vector.broadcast %cst_33 : bf16 to vector<10x7x4xbf16>
    %c0_34 = arith.constant 0 : index
    %c9_35 = arith.constant 9 : index
    %c0_36 = arith.constant 0 : index
    %24 = vector.load %arg15[%c0_34, %c9_35, %c0_36] : memref<10x16x4xbf16, #tpu.memory_space<vmem>>, vector<10x7x4xbf16>
    tpu.vector_store %arg15[%c0_34, %c9_35, %c0_36], %23 {strides = array<i32>} : memref<10x16x4xbf16, #tpu.memory_space<vmem>>, vector<10x7x4xbf16>,
    %c0_i32 = arith.constant 0 : i32
    %25 = arith.cmpi eq, %arg1, %c0_i32 : i32
    %26 = arith.extui %25 : i1 to i32
    %c0_i32_37 = arith.constant 0 : i32
    %27 = arith.cmpi ne, %26, %c0_i32_37 : i32
    scf.if %27 {
      %cst_112 = arith.constant 0.000000e+00 : bf16
      %115 = vector.broadcast %cst_112 : bf16 to vector<1x16x4xbf16>
      %c0_113 = arith.constant 0 : index
      %c0_114 = arith.constant 0 : index
      %c0_115 = arith.constant 0 : index
      %116 = vector.load %arg15[%c0_113, %c0_114, %c0_115] : memref<10x16x4xbf16, #tpu.memory_space<vmem>>, vector<1x16x4xbf16>
      tpu.vector_store %arg15[%c0_113, %c0_114, %c0_115], %115 {strides = array<i32>} : memref<10x16x4xbf16, #tpu.memory_space<vmem>>, vector<1x16x4xbf16>,
    } else {
    }
    %c0_i32_38 = arith.constant 0 : i32
    %28 = arith.cmpi eq, %arg1, %c0_i32_38 : i32
    %29 = arith.extui %28 : i1 to i32
    %c0_i32_39 = arith.constant 0 : i32
    %30 = arith.cmpi ne, %29, %c0_i32_39 : i32
    scf.if %30 {
      %cst_112 = arith.constant 0.000000e+00 : bf16
      %115 = vector.broadcast %cst_112 : bf16 to vector<1x16x4xbf16>
      %c9_113 = arith.constant 9 : index
      %c0_114 = arith.constant 0 : index
      %c0_115 = arith.constant 0 : index
      %116 = vector.load %arg15[%c9_113, %c0_114, %c0_115] : memref<10x16x4xbf16, #tpu.memory_space<vmem>>, vector<1x16x4xbf16>
      tpu.vector_store %arg15[%c9_113, %c0_114, %c0_115], %115 {strides = array<i32>} : memref<10x16x4xbf16, #tpu.memory_space<vmem>>, vector<1x16x4xbf16>,
    } else {
    }
    %c0_40 = arith.constant 0 : index
    %c0_41 = arith.constant 0 : index
    %c0_42 = arith.constant 0 : index
    %31 = vector.load %arg15[%c0_40, %c0_41, %c0_42] : memref<10x16x4xbf16, #tpu.memory_space<vmem>>, vector<10x16x4xbf16>
    %cst_43 = arith.constant 0.000000e+00 : f32
    %32 = vector.broadcast %cst_43 : f32 to vector<128x4xf32>
    %cst_44 = arith.constant 0.000000e+00 : f32
    %33 = vector.broadcast %cst_44 : f32 to vector<128x4xf32>
    %cst_45 = arith.constant 0.000000e+00 : f32
    %34 = vector.broadcast %cst_45 : f32 to vector<128x4xf32>
    %35 = vector.extract_strided_slice %31 {offsets = [0, 0, 0], sizes = [8, 16, 4], strides = [1, 1, 1]} : vector<10x16x4xbf16> to vector<8x16x4xbf16>
    %36 = vector.shape_cast %35 : vector<8x16x4xbf16> to vector<128x4xbf16>
    %c0_46 = arith.constant 0 : index
    %c0_47 = arith.constant 0 : index
    %c0_48 = arith.constant 0 : index
    %c0_49 = arith.constant 0 : index
    %37 = vector.load %arg7[%c0_46, %c0_47, %c0_48, %c0_49] : memref<3x3x4x4xbf16, #tpu.memory_space<vmem>>, vector<1x1x4x4xbf16>
    %38 = vector.shape_cast %37 : vector<1x1x4x4xbf16> to vector<4x4xbf16>
    %cst_50 = arith.constant dense<0.000000e+00> : vector<128x4xf32>
    %39 = tpu.matmul %36, %38, %cst_50 {dimension_numbers = #tpu.dot_dimension_numbers<[1], [0], [0], [1], [0, 0, 1, 1], [], []>} : vector<128x4xbf16>, vector<4x4xbf16>, vector<128x4xf32> -> vector<128x4xf32>
    %40 = arith.addf %32, %39 : vector<128x4xf32>
    %c0_51 = arith.constant 0 : index
    %c1_52 = arith.constant 1 : index
    %c0_53 = arith.constant 0 : index
    %c0_54 = arith.constant 0 : index
    %41 = vector.load %arg7[%c0_51, %c1_52, %c0_53, %c0_54] : memref<3x3x4x4xbf16, #tpu.memory_space<vmem>>, vector<1x1x4x4xbf16>
    %42 = vector.shape_cast %41 : vector<1x1x4x4xbf16> to vector<4x4xbf16>
    %cst_55 = arith.constant dense<0.000000e+00> : vector<128x4xf32>
    %43 = tpu.matmul %36, %42, %cst_55 {dimension_numbers = #tpu.dot_dimension_numbers<[1], [0], [0], [1], [0, 0, 1, 1], [], []>} : vector<128x4xbf16>, vector<4x4xbf16>, vector<128x4xf32> -> vector<128x4xf32>
    %44 = arith.addf %33, %43 : vector<128x4xf32>
    %c0_56 = arith.constant 0 : index
    %c2 = arith.constant 2 : index
    %c0_57 = arith.constant 0 : index
    %c0_58 = arith.constant 0 : index
    %45 = vector.load %arg7[%c0_56, %c2, %c0_57, %c0_58] : memref<3x3x4x4xbf16, #tpu.memory_space<vmem>>, vector<1x1x4x4xbf16>
    %46 = vector.shape_cast %45 : vector<1x1x4x4xbf16> to vector<4x4xbf16>
    %cst_59 = arith.constant dense<0.000000e+00> : vector<128x4xf32>
    %47 = tpu.matmul %36, %46, %cst_59 {dimension_numbers = #tpu.dot_dimension_numbers<[1], [0], [0], [1], [0, 0, 1, 1], [], []>} : vector<128x4xbf16>, vector<4x4xbf16>, vector<128x4xf32> -> vector<128x4xf32>
    %48 = arith.addf %34, %47 : vector<128x4xf32>
    %49 = vector.extract_strided_slice %31 {offsets = [1, 0, 0], sizes = [8, 16, 4], strides = [1, 1, 1]} : vector<10x16x4xbf16> to vector<8x16x4xbf16>
    %50 = vector.shape_cast %49 : vector<8x16x4xbf16> to vector<128x4xbf16>
    %c1_60 = arith.constant 1 : index
    %c0_61 = arith.constant 0 : index
    %c0_62 = arith.constant 0 : index
    %c0_63 = arith.constant 0 : index
    %51 = vector.load %arg7[%c1_60, %c0_61, %c0_62, %c0_63] : memref<3x3x4x4xbf16, #tpu.memory_space<vmem>>, vector<1x1x4x4xbf16>
    %52 = vector.shape_cast %51 : vector<1x1x4x4xbf16> to vector<4x4xbf16>
    %cst_64 = arith.constant dense<0.000000e+00> : vector<128x4xf32>
    %53 = tpu.matmul %50, %52, %cst_64 {dimension_numbers = #tpu.dot_dimension_numbers<[1], [0], [0], [1], [0, 0, 1, 1], [], []>} : vector<128x4xbf16>, vector<4x4xbf16>, vector<128x4xf32> -> vector<128x4xf32>
    %54 = arith.addf %40, %53 : vector<128x4xf32>
    %c1_65 = arith.constant 1 : index
    %c1_66 = arith.constant 1 : index
    %c0_67 = arith.constant 0 : index
    %c0_68 = arith.constant 0 : index
    %55 = vector.load %arg7[%c1_65, %c1_66, %c0_67, %c0_68] : memref<3x3x4x4xbf16, #tpu.memory_space<vmem>>, vector<1x1x4x4xbf16>
    %56 = vector.shape_cast %55 : vector<1x1x4x4xbf16> to vector<4x4xbf16>
    %cst_69 = arith.constant dense<0.000000e+00> : vector<128x4xf32>
    %57 = tpu.matmul %50, %56, %cst_69 {dimension_numbers = #tpu.dot_dimension_numbers<[1], [0], [0], [1], [0, 0, 1, 1], [], []>} : vector<128x4xbf16>, vector<4x4xbf16>, vector<128x4xf32> -> vector<128x4xf32>
    %58 = arith.addf %44, %57 : vector<128x4xf32>
    %c1_70 = arith.constant 1 : index
    %c2_71 = arith.constant 2 : index
    %c0_72 = arith.constant 0 : index
    %c0_73 = arith.constant 0 : index
    %59 = vector.load %arg7[%c1_70, %c2_71, %c0_72, %c0_73] : memref<3x3x4x4xbf16, #tpu.memory_space<vmem>>, vector<1x1x4x4xbf16>
    %60 = vector.shape_cast %59 : vector<1x1x4x4xbf16> to vector<4x4xbf16>
    %cst_74 = arith.constant dense<0.000000e+00> : vector<128x4xf32>
    %61 = tpu.matmul %50, %60, %cst_74 {dimension_numbers = #tpu.dot_dimension_numbers<[1], [0], [0], [1], [0, 0, 1, 1], [], []>} : vector<128x4xbf16>, vector<4x4xbf16>, vector<128x4xf32> -> vector<128x4xf32>
    %62 = arith.addf %48, %61 : vector<128x4xf32>
    %63 = vector.extract_strided_slice %31 {offsets = [2, 0, 0], sizes = [8, 16, 4], strides = [1, 1, 1]} : vector<10x16x4xbf16> to vector<8x16x4xbf16>
    %64 = vector.shape_cast %63 : vector<8x16x4xbf16> to vector<128x4xbf16>
    %c2_75 = arith.constant 2 : index
    %c0_76 = arith.constant 0 : index
    %c0_77 = arith.constant 0 : index
    %c0_78 = arith.constant 0 : index
    %65 = vector.load %arg7[%c2_75, %c0_76, %c0_77, %c0_78] : memref<3x3x4x4xbf16, #tpu.memory_space<vmem>>, vector<1x1x4x4xbf16>
    %66 = vector.shape_cast %65 : vector<1x1x4x4xbf16> to vector<4x4xbf16>
    %cst_79 = arith.constant dense<0.000000e+00> : vector<128x4xf32>
    %67 = tpu.matmul %64, %66, %cst_79 {dimension_numbers = #tpu.dot_dimension_numbers<[1], [0], [0], [1], [0, 0, 1, 1], [], []>} : vector<128x4xbf16>, vector<4x4xbf16>, vector<128x4xf32> -> vector<128x4xf32>
    %68 = arith.addf %54, %67 : vector<128x4xf32>
    %c2_80 = arith.constant 2 : index
    %c1_81 = arith.constant 1 : index
    %c0_82 = arith.constant 0 : index
    %c0_83 = arith.constant 0 : index
    %69 = vector.load %arg7[%c2_80, %c1_81, %c0_82, %c0_83] : memref<3x3x4x4xbf16, #tpu.memory_space<vmem>>, vector<1x1x4x4xbf16>
    %70 = vector.shape_cast %69 : vector<1x1x4x4xbf16> to vector<4x4xbf16>
    %cst_84 = arith.constant dense<0.000000e+00> : vector<128x4xf32>
    %71 = tpu.matmul %64, %70, %cst_84 {dimension_numbers = #tpu.dot_dimension_numbers<[1], [0], [0], [1], [0, 0, 1, 1], [], []>} : vector<128x4xbf16>, vector<4x4xbf16>, vector<128x4xf32> -> vector<128x4xf32>
    %72 = arith.addf %58, %71 : vector<128x4xf32>
    %c2_85 = arith.constant 2 : index
    %c2_86 = arith.constant 2 : index
    %c0_87 = arith.constant 0 : index
    %c0_88 = arith.constant 0 : index
    %73 = vector.load %arg7[%c2_85, %c2_86, %c0_87, %c0_88] : memref<3x3x4x4xbf16, #tpu.memory_space<vmem>>, vector<1x1x4x4xbf16>
    %74 = vector.shape_cast %73 : vector<1x1x4x4xbf16> to vector<4x4xbf16>
    %cst_89 = arith.constant dense<0.000000e+00> : vector<128x4xf32>
    %75 = tpu.matmul %64, %74, %cst_89 {dimension_numbers = #tpu.dot_dimension_numbers<[1], [0], [0], [1], [0, 0, 1, 1], [], []>} : vector<128x4xbf16>, vector<4x4xbf16>, vector<128x4xf32> -> vector<128x4xf32>
    %76 = arith.addf %62, %75 : vector<128x4xf32>
    %77 = vector.extract_strided_slice %72 {offsets = [1, 0], sizes = [127, 4], strides = [1, 1]} : vector<128x4xf32> to vector<127x4xf32>
    %78 = vector.extract_strided_slice %72 {offsets = [0, 0], sizes = [1, 4], strides = [1, 1]} : vector<128x4xf32> to vector<1x4xf32>
    %79 = tpu.concatenate %77, %78 in 0 : vector<127x4xf32>, vector<1x4xf32> -> vector<128x4xf32>
    %80 = arith.addf %68, %79 : vector<128x4xf32>
    %81 = vector.extract_strided_slice %76 {offsets = [2, 0], sizes = [126, 4], strides = [1, 1]} : vector<128x4xf32> to vector<126x4xf32>
    %82 = vector.extract_strided_slice %76 {offsets = [0, 0], sizes = [2, 4], strides = [1, 1]} : vector<128x4xf32> to vector<2x4xf32>
    %83 = tpu.concatenate %81, %82 in 0 : vector<126x4xf32>, vector<2x4xf32> -> vector<128x4xf32>
    %84 = arith.addf %80, %83 : vector<128x4xf32>
    %c0_90 = arith.constant 0 : index
    %c0_91 = arith.constant 0 : index
    %85 = vector.load %arg8[%c0_90, %c0_91] : memref<1x4xf32, #tpu.memory_space<vmem>>, vector<1x4xf32>
    %86 = vector.broadcast %85 : vector<1x4xf32> to vector<128x4xf32>
    %87 = arith.addf %84, %86 : vector<128x4xf32>
    %cst_92 = arith.constant 0.000000e+00 : f32
    %88 = vector.broadcast %cst_92 : f32 to vector<128x4xf32>
    %89 = arith.maximumf %87, %88 : vector<128x4xf32>
    %90 = arith.truncf %89 : vector<128x4xf32> to vector<128x4xbf16>
    %c0_93 = arith.constant 0 : index
    %c0_94 = arith.constant 0 : index
    %91 = vector.load %arg9[%c0_93, %c0_94] : memref<4x8xbf16, #tpu.memory_space<vmem>>, vector<4x8xbf16>
    %cst_95 = arith.constant dense<0.000000e+00> : vector<128x8xf32>
    %92 = tpu.matmul %90, %91, %cst_95 {dimension_numbers = #tpu.dot_dimension_numbers<[1], [0], [0], [1], [0, 0, 1, 1], [], []>} : vector<128x4xbf16>, vector<4x8xbf16>, vector<128x8xf32> -> vector<128x8xf32>
    %93 = vector.shape_cast %92 : vector<128x8xf32> to vector<8x16x8xf32>
    %94 = vector.extract_strided_slice %93 {offsets = [0, 0, 0], sizes = [8, 8, 8], strides = [1, 1, 1]} : vector<8x16x8xf32> to vector<8x8x8xf32>
    %c0_96 = arith.constant 0 : index
    %c0_97 = arith.constant 0 : index
    %c0_98 = arith.constant 0 : index
    %c0_99 = arith.constant 0 : index
    %95 = vector.load %arg3[%c0_96, %c0_97, %c0_98, %c0_99] : memref<1x8x8x4xbf16, #tpu.memory_space<vmem>>, vector<1x8x8x4xbf16>
    %96 = vector.shape_cast %95 : vector<1x8x8x4xbf16> to vector<8x8x4xbf16>
    %97 = vector.shape_cast %96 : vector<8x8x4xbf16> to vector<64x4xbf16>
    %c0_100 = arith.constant 0 : index
    %c0_101 = arith.constant 0 : index
    %98 = vector.load %arg11[%c0_100, %c0_101] : memref<4x8xbf16, #tpu.memory_space<vmem>>, vector<4x8xbf16>
    %cst_102 = arith.constant dense<0.000000e+00> : vector<64x8xf32>
    %99 = tpu.matmul %97, %98, %cst_102 {dimension_numbers = #tpu.dot_dimension_numbers<[1], [0], [0], [1], [0, 0, 1, 1], [], []>} : vector<64x4xbf16>, vector<4x8xbf16>, vector<64x8xf32> -> vector<64x8xf32>
    %100 = vector.shape_cast %99 : vector<64x8xf32> to vector<8x8x8xf32>
    %c0_103 = arith.constant 0 : index
    %c0_104 = arith.constant 0 : index
    %101 = vector.load %arg10[%c0_103, %c0_104] : memref<1x8xf32, #tpu.memory_space<vmem>>, vector<1x8xf32>
    %102 = vector.shape_cast %101 : vector<1x8xf32> to vector<1x1x8xf32>
    %103 = vector.broadcast %102 : vector<1x1x8xf32> to vector<8x8x8xf32>
    %104 = arith.addf %94, %103 : vector<8x8x8xf32>
    %105 = arith.addf %104, %100 : vector<8x8x8xf32>
    %c0_105 = arith.constant 0 : index
    %c0_106 = arith.constant 0 : index
    %106 = vector.load %arg12[%c0_105, %c0_106] : memref<1x8xf32, #tpu.memory_space<vmem>>, vector<1x8xf32>
    %107 = vector.shape_cast %106 : vector<1x8xf32> to vector<1x1x8xf32>
    %108 = vector.broadcast %107 : vector<1x1x8xf32> to vector<8x8x8xf32>
    %109 = arith.addf %105, %108 : vector<8x8x8xf32>
    %cst_107 = arith.constant 0.000000e+00 : f32
    %110 = vector.broadcast %cst_107 : f32 to vector<8x8x8xf32>
    %111 = arith.maximumf %109, %110 : vector<8x8x8xf32>
    %c0_108 = arith.constant 0 : index
    %c0_109 = arith.constant 0 : index
    %c0_110 = arith.constant 0 : index
    %c0_111 = arith.constant 0 : index
    %112 = vector.load %arg13[%c0_108, %c0_109, %c0_110, %c0_111] : memref<1x8x8x8xf32, #tpu.memory_space<vmem>>, vector<1x8x8x8xf32>
    %113 = vector.shape_cast %112 : vector<1x8x8x8xf32> to vector<8x8x8xf32>
    %114 = vector.shape_cast %111 : vector<8x8x8xf32> to vector<1x8x8x8xf32>
    tpu.vector_store %arg13[%c0_108, %c0_109, %c0_110, %c0_111], %114 {strides = array<i32>} : memref<1x8x8x8xf32, #tpu.memory_space<vmem>>, vector<1x8x8x8xf32>,
    return
  }
  func.func @transform_0(%arg0: i32, %arg1: i32) -> (i32, i32, i32, i32) {
    %c8_i32 = arith.constant 8 : i32
    %0 = arith.muli %arg1, %c8_i32 : i32
    %c1_i32 = arith.constant 1 : i32
    %1 = arith.subi %0, %c1_i32 : i32
    %c0_i32 = arith.constant 0 : i32
    %2 = arith.maxsi %1, %c0_i32 : i32
    %c0_i32_0 = arith.constant 0 : i32
    %c0_i32_1 = arith.constant 0 : i32
    %c0_i32_2 = arith.constant 0 : i32
    return %arg0, %2, %c0_i32_0, %c0_i32_1 : i32, i32, i32, i32
  }
  func.func @transform_1(%arg0: i32, %arg1: i32) -> (i32, i32, i32, i32) {
    %c0_i32 = arith.constant 0 : i32
    %c0_i32_0 = arith.constant 0 : i32
    %c0_i32_1 = arith.constant 0 : i32
    return %arg0, %arg1, %c0_i32, %c0_i32_0 : i32, i32, i32, i32
  }
  func.func @transform_2(%arg0: i32, %arg1: i32) -> (i32, i32, i32, i32) {
    %c8_i32 = arith.constant 8 : i32
    %0 = arith.muli %arg1, %c8_i32 : i32
    %c8_i32_0 = arith.constant 8 : i32
    %1 = arith.addi %0, %c8_i32_0 : i32
    %c7_i32 = arith.constant 7 : i32
    %2 = arith.minsi %1, %c7_i32 : i32
    %c0_i32 = arith.constant 0 : i32
    %c0_i32_1 = arith.constant 0 : i32
    %c0_i32_2 = arith.constant 0 : i32
    return %arg0, %2, %c0_i32, %c0_i32_1 : i32, i32, i32, i32
  }
  func.func @transform_3(%arg0: i32, %arg1: i32) -> (i32, i32) {
    %c0_i32 = arith.constant 0 : i32
    %c0_i32_0 = arith.constant 0 : i32
    %c0_i32_1 = arith.constant 0 : i32
    return %c0_i32, %c0_i32_0 : i32, i32
  }
  func.func @transform_4(%arg0: i32, %arg1: i32) -> (i32, i32) {
    %c0_i32 = arith.constant 0 : i32
    %c0_i32_0 = arith.constant 0 : i32
    %c0_i32_1 = arith.constant 0 : i32
    return %c0_i32, %c0_i32_0 : i32, i32
  }
  func.func @transform_5(%arg0: i32, %arg1: i32) -> (i32, i32, i32, i32) {
    %c0_i32 = arith.constant 0 : i32
    %c0_i32_0 = arith.constant 0 : i32
    %c0_i32_1 = arith.constant 0 : i32
    %c0_i32_2 = arith.constant 0 : i32
    %c0_i32_3 = arith.constant 0 : i32
    return %c0_i32, %c0_i32_0, %c0_i32_1, %c0_i32_2 : i32, i32, i32, i32
  }
  func.func @transform_6(%arg0: i32, %arg1: i32) -> (i32, i32) {
    %c0_i32 = arith.constant 0 : i32
    %c0_i32_0 = arith.constant 0 : i32
    %c0_i32_1 = arith.constant 0 : i32
    return %c0_i32, %c0_i32_0 : i32, i32
  }
  func.func @transform_7(%arg0: i32, %arg1: i32) -> (i32, i32) {
    %c0_i32 = arith.constant 0 : i32
    %c0_i32_0 = arith.constant 0 : i32
    %c0_i32_1 = arith.constant 0 : i32
    return %c0_i32, %c0_i32_0 : i32, i32
  }
  func.func @transform_8(%arg0: i32, %arg1: i32) -> (i32, i32) {
    %c0_i32 = arith.constant 0 : i32
    %c0_i32_0 = arith.constant 0 : i32
    %c0_i32_1 = arith.constant 0 : i32
    return %c0_i32, %c0_i32_0 : i32, i32
  }
  func.func @transform_9(%arg0: i32, %arg1: i32) -> (i32, i32) {
    %c0_i32 = arith.constant 0 : i32
    %c0_i32_0 = arith.constant 0 : i32
    %c0_i32_1 = arith.constant 0 : i32
    return %c0_i32, %c0_i32_0 : i32, i32
  }
  func.func @transform_10(%arg0: i32, %arg1: i32) -> (i32, i32) {
    %c0_i32 = arith.constant 0 : i32
    %c0_i32_0 = arith.constant 0 : i32
    %c0_i32_1 = arith.constant 0 : i32
    return %c0_i32, %c0_i32_0 : i32, i32
  }
  func.func @transform_11(%arg0: i32, %arg1: i32) -> (i32, i32, i32, i32) {
    %c0_i32 = arith.constant 0 : i32
    %c0_i32_0 = arith.constant 0 : i32
    %c0_i32_1 = arith.constant 0 : i32
    return %arg0, %arg1, %c0_i32, %c0_i32_0 : i32, i32, i32, i32
  }
}

</mosaic_0001>

<bundles_post_ra>
// kernel: downsampling_block.1
= control target key start
LH: loop header
LB: loop body
LE: loop exit
PB: predicated region body
PF: predicated region fallthrough
CT: control target
= control target key end

     0   :  { %s3244_s17 = smov 0   ;;  %s3246_s18 = smov 0   ;;  %s3768_s0 = inlined_call_operand.vmem [shape: bf16[2,8,8,4], index: 0, kind: input, shape index: {}, may-alias: {0,1,2}]   ;;  %s3769_s1 = inlined_call_operand.vmem [shape: bf16[2,8,8,4], index: 1, kind: input, shape index: {}, may-alias: {0,1,2}]   ;;  %s3770_s2 = inlined_call_operand.vmem [shape: bf16[2,8,8,4], index: 2, kind: input, shape index: {}, may-alias: {0,1,2}]   ;;  %s3771_s3 = inlined_call_operand.vmem [shape: bf16[4,4], index: 3, kind: input, shape index: {}]   ;;  %s3772_s4 = inlined_call_operand.vmem [shape: f32[1,4], index: 4, kind: input, shape index: {}]   ;;  %s3773_s5 = inlined_call_operand.vmem [shape: bf16[3,3,4,4], index: 5, kind: input, shape index: {}]   ;;  %s3774_s6 = inlined_call_operand.vmem [shape: f32[1,4], index: 6, kind: input, shape index: {}]   ;;  %s3775_s7 = inlined_call_operand.vmem [shape: bf16[4,8], index: 7, kind: input, shape index: {}]   ;;  %s3776_s8 = inlined_call_operand.vmem [shape: f32[1,8], index: 8, kind: input, shape index: {}]   ;;  %s3777_s9 = inlined_call_operand.vmem [shape: bf16[4,8], index: 9, kind: input, shape index: {}]   ;;  %s3778_s10 = inlined_call_operand.vmem [shape: f32[1,8], index: 10, kind: input, shape index: {}]   ;;  %s3779_s11 = inlined_call_operand.vmem [shape: f32[2,8,8,8], index: 11, kind: output, shape index: {}]  }
   0x1   :  { %s3248_s19 = smov 0  }
   0x2 LB: > { %s33_s20 = sadd.s32 1, %s3175_s18  ;;  %p2554_p0 = scmp.ge.s32.totalorder %s3179_s19, 1  ;;  %s3179_s19 = sphi %s3248_s19, %s21_s19   ;;  %s3175_s18 = sphi %s3246_s18, %s3787_s18   ;;  %s3171_s17 = sphi %s3244_s17, %s3786_s17  }
   0x3   : > { %p35_p1 = scmp.ge.s32.totalorder %s33_s20, 2  ;;  %p420_p2 = scmp.lt.s32.totalorder %s3179_s19, 3 }
   0x5   : > { %s3789_s20 = smov (%p35_p1, %s33_s20), 0  ;;  %p421_p3 = pnand %p2554_p0, %p420_p2 }
   0x6   : > { %v578_v0 = vld [vmem:[%s3771_s3] sm:$0x3] (!%p421_p3)  ;;  %vm627_vm0 = vcmask (!%p421_p3), 1041408   ;;  %p496_p4 = scmp.lt.s32.totalorder (!%p421_p3), %s3171_s17, 1  ;;  %v3181_v1 = vmov (!%p421_p3), 0.0   ;;  %vm3182_vm1 = vmmov (!%p421_p3), 0  }
   0x7   : > { %424 = sbr.rel (%p421_p3) target bundleno = 933 (0x3a5), region = 64  ;;  %2802 = vmatprep.subr.bf16.mxu0 (!%p421_p3), %v3181_v1  ;;  %v629_v2 = vsel (!%p421_p3), %vm627_vm0, %v578_v0, 0  ;;  %2804 = vmatprep.mubr.msk.bf16.mxu0 (!%p421_p3), %vm3182_vm1, %v3181_v1  ;;  %vm546_vm2 = vcmask (!%p421_p3), 27648   ;;  %vm611_vm3 = vcmask (!%p421_p3), 31744   ;;  %v2586_v18 = vld [vmem:[%s3773_s5 + $0x6] sm:$0x3] (!%p421_p3) }
   0x8   : > { %2803 = vmatpush3.bf16.msra.mxu0 (!%p421_p3), %v629_v2  ;;  %v2603_v19 = vld [vmem:[%s3773_s5 + $0x8] sm:$0x3] (!%p421_p3)  ;;  %3110 = vmatprep.subr.msk.bf16.mxu1 (!%p421_p3), %vm627_vm0, %v2586_v18  ;;  %v972_v20 = vsel (!%p421_p3), %vm627_vm0, %v2586_v18, 0  ;;  %v3321_v22 = vld [vmem:[%s3773_s5] sm:$0x3] (!%p421_p3)  ;;  %vm824_vm4 = vcmask (!%p421_p3), 28672  }
   0x9   : > { %3112 = vmatprep.subr.msk.bf16.mxu0 (!%p421_p3), %vm627_vm0, %v2603_v19  ;;  %v1177_v21 = vsel (!%p421_p3), %vm627_vm0, %v2603_v19, 0  ;;  %2825 = vmatpush3.bf16.msra.mxu1 (!%p421_p3), %v972_v20  ;;  %v3328_v23 = vld [vmem:[%s3773_s5 + $0x2] sm:$0x3] (!%p421_p3)  ;;  %v3335_v24 = vld [vmem:[%s3772_s4] ss:$0 sm:$0xff] (!%p421_p3)  ;;  %vm857_vm7 = vcmask (!%p421_p3), 24576  }
   0xa   : > { %3111 = vmatprep.subr.msk.bf16.mxu1 (!%p421_p3), %vm627_vm0, %v3321_v22  ;;  %vm825_vm5 = vsmask.f32 (!%p421_p3), 4354  ;;  %v827_v43 = vld [vmem:[#allocation3] sm:$0x1f] (!%p421_p3)  ;;  %v830_v51 = vld [vmem:[#allocation3 + $0x8] sm:$0x1f] (!%p421_p3) }
   0xb   : > { %vm3340_vm6 = vmand (!%p421_p3), %vm824_vm4, %vm825_vm5  ;;  %vm858_vm8 = vsmask.f32 (!%p421_p3), 256  ;;  %vm890_vm9 = vcmask (!%p421_p3), 31748   ;;  %vm891_vm10 = vsmask.f32 (!%p421_p3), 7954  ;;  %vm1951_vm13 = vcmask (!%p421_p3), 1046528  }
   0xc   : > { %vm3350_vm11 = vmand (!%p421_p3), %vm857_vm7, %vm858_vm8  ;;  %v833_v2 = vld [vmem:[#allocation3 + $0x10] sm:$0x1f] (!%p421_p3)  ;;  %vm2033_vm14 = vcmask (!%p421_p3), 1045504   ;;  %vm2418_vm15 = vcmask (!%p421_p3), 64512  }
   0xd   : > { %vm3354_vm12 = vmand (!%p421_p3), %vm890_vm9, %vm891_vm10 }
   0xe   : > { %s3791_s17 = smov (!%p496_p4, %s3171_s17), 1 }
   0xf   : > { %s2685_s23 = sshll.u32 %s3791_s17, 5  ;;  %s2689_s16 = sshll.u32 %s3791_s17, 6 }
  0x10   : > { %s503_s26 = scalar_lea.vmem %s3768_s0, %s2685_s23  ;;  %s3276_s29 = scalar_lea.vmem %s3769_s1, %s2685_s23 }
  0x11   : > { %v545_v3 = vld [vmem:[%s503_s26] sm:$0xf]  ;;  %v549_v5 = vld [vmem:[%s3276_s29 + $0x4] sm:$0xf]  ;;  %v550_v6 = vld [vmem:[%s3276_s29 + $0x8] sm:$0xf] }
  0x12   : > { %v548_v4 = vld [vmem:[%s3276_s29] sm:$0xf]  ;;  %547 = vst.msk [vmem:[#allocation2] sm:$0xf] %vm546_vm2, %v545_v3  ;;  %558 = vst.msk [vmem:[#allocation2 + $0x8] sm:$0xf] %vm546_vm2, %v549_v5 }
  0x13   : > { %557 = vst.msk [vmem:[#allocation2 + $0x4] sm:$0xf] %vm546_vm2, %v548_v4  ;;  %v551_v7 = vld [vmem:[%s3276_s29 + $0xc] sm:$0xf]  ;;  %v552_v8 = vld [vmem:[%s3276_s29 + $0x10] sm:$0xf] }
  0x14   : > { %559 = vst.msk [vmem:[#allocation2 + $0xc] sm:$0xf] %vm546_vm2, %v550_v6  ;;  %560 = vst.msk [vmem:[#allocation2 + $0x10] sm:$0xf] %vm546_vm2, %v551_v7  ;;  %v553_v9 = vld [vmem:[%s3276_s29 + $0x14] sm:$0xf] }
  0x15   : > { %561 = vst.msk [vmem:[#allocation2 + $0x14] sm:$0xf] %vm546_vm2, %v552_v8  ;;  %v554_v10 = vld [vmem:[%s3276_s29 + $0x18] sm:$0xf]  ;;  %s2688_s30 = sadd.s32 28, %s2685_s23  ;;  %s3741_s23 = scalar_lea.vmem %s3779_s11, %s2689_s16 }
  0x16   : > { %562 = vst.msk [vmem:[#allocation2 + $0x18] sm:$0xf] %vm546_vm2, %v553_v9  ;;  %563 = vst.msk [vmem:[#allocation2 + $0x1c] sm:$0xf] %vm546_vm2, %v554_v10  ;;  %s529_s14 = scalar_lea.vmem %s3770_s2, %s2688_s30  ;;  %v555_v11 = vld [vmem:[%s3276_s29 + $0x1c] sm:$0xf] }
  0x17   : > { %564 = vst.msk [vmem:[#allocation2 + $0x20] sm:$0xf] %vm546_vm2, %v555_v11  ;;  %v565_v12 = vld [vmem:[%s529_s14] sm:$0xf] }
  0x18   : > { %567 = vst.msk [vmem:[#allocation2 + $0x24] sm:$0xf] %vm546_vm2, %v565_v12  ;;  %v836_v11 = vld [vmem:[#allocation3 + $0x18] sm:$0x1f] }
  0x1a   : > { %v3148_v13 = vld [vmem:[#allocation2] sm:$0xff]  }
  0x1b   : > { %2805 = vmatmul.mubr.msk.bf16.vlgmr.msra.gmra.mrb[0].mxu0 %vm611_vm3, %v3148_v13  ;;  %v3149_v14 = vld [vmem:[#allocation2 + $0x8] sm:$0xff]  }
  0x1c   : > { %2808 = vmatprep.mubr.msk.bf16.mxu0 %vm3182_vm1, %v3181_v1  ;;  %v3150_v15 = vld [vmem:[#allocation2 + $0x10] sm:$0xff]   ;;  %2861 = vmatpush3.bf16.msra.mxu0 %v1177_v21 }
  0x1d   : > { %v3151_v16 = vld [vmem:[#allocation2 + $0x18] sm:$0xff]   ;;  %3113 = vmatprep.subr.msk.bf16.mxu0 %vm627_vm0, %v3328_v23 }
  0x1f   : > { %v3152_v17 = vld [vmem:[#allocation2 + $0x20] sm:$0xff]  }
  0x23   : > { %2809 = vmatmul.mubr.msk.bf16.gmra.mrb[4].mxu0 %vm611_vm3, %v3149_v14 }
  0x24   : > { %2812 = vmatprep.mubr.msk.bf16.mxu0 %vm3182_vm1, %v3181_v1 }
  0x2b   : > { %2813 = vmatmul.mubr.msk.bf16.gmra.mrb[8].mxu0 %vm611_vm3, %v3150_v15 }
  0x2c   : > { %2816 = vmatprep.mubr.msk.bf16.mxu0 %vm3182_vm1, %v3181_v1 }
  0x33   : > { %2817 = vmatmul.mubr.msk.bf16.gmra.mrb[12].mxu0 %vm611_vm3, %v3151_v16 }
  0x34   : > { %2820 = vmatprep.mubr.msk.bf16.mxu0 %vm3182_vm1, %v3181_v1 }
  0x3b   : > { %2821 = vmatmul.mubr.msk.bf16.gmra.mrb[16].mxu0 %vm611_vm3, %v3152_v17 }
  0xee   : > { %v665_v25 = vpop.f32.mrb[0].mxu0 }
  0xef   : > { %v666_v26 = vadd.f32 %v3335_v24, %v665_v25  ;;  %v2806_v27 = vpop.f32.mrb[1].mxu0 }
  0xf0   : > { %v668_v28 = vpop.f32.mrb[2].mxu0 }
  0xf1   : > { %v704_v29 = vmax.f32 %v666_v26, 0.0  ;;  %v669_v30 = vadd.f32 %v3335_v24, %v668_v28  ;;  %v2807_v31 = vpop.f32.mrb[3].mxu0  ;;  %v3183_v28 = vmov 0  }
  0xf3   : > { %v2690_v32 = vpack.c.bf16 %v704_v29, %v704_v29  ;;  %v705_v33 = vmax.f32 %v669_v30, 0.0 }
  0xf5   : > { %v745_v34 = vshrl.u32 %v2690_v32, 16  ;;  %v2691_v35 = vpack.c.bf16 %v705_v33, %v705_v33  ;;  %v748_v38 = vshll.u32 %v2690_v32, 16 }
  0xf6   : > { %v673_v36 = vpop.f32.mrb[4].mxu0 }
  0xf7   : > { %v747_v37 = vrot.slane %v745_v34, 7  ;;  %v752_v39 = vshrl.u32 %v2691_v35, 16  ;;  %v674_v40 = vadd.f32 %v3335_v24, %v673_v36  ;;  %v2810_v41 = vpop.f32.mrb[5].mxu0  ;;  %v755_v44 = vshll.u32 %v2691_v35, 16 }
  0xf8   : > { %v676_v45 = vpop.f32.mrb[6].mxu0 }
  0xf9   : > { %v750_v46 = vor.u32 %v748_v38, %v747_v37  ;;  %v754_v47 = vrot.slane %v752_v39, 7  ;;  %v706_v48 = vmax.f32 %v674_v40, 0.0  ;;  %v677_v49 = vadd.f32 %v3335_v24, %v676_v45  ;;  %v2811_v50 = vpop.f32.mrb[7].mxu0  ;;  %v839_v37 = vld [vmem:[#allocation3 + $0x20] sm:$0x1f] }
  0xfb   : > { %v828_v52 = vsel %vm3340_vm6, %v750_v46, %v827_v43  ;;  %v757_v53 = vor.u32 %v755_v44, %v754_v47  ;;  %v2692_v54 = vpack.c.bf16 %v706_v48, %v706_v48  ;;  %v707_v55 = vmax.f32 %v677_v49, 0.0  ;;  %v842_v46 = vld [vmem:[#allocation3 + $0x28] sm:$0x1f] }
  0xfc   : > { %829 = vst [vmem:[#allocation3] sm:$0x1f] %v828_v52 }
  0xfd   : > { %v831_v56 = vsel %vm3340_vm6, %v757_v53, %v830_v51  ;;  %v759_v57 = vshrl.u32 %v2692_v54, 16  ;;  %v2693_v58 = vpack.c.bf16 %v707_v55, %v707_v55  ;;  %v762_v61 = vshll.u32 %v2692_v54, 16 }
  0xfe   : > { %832 = vst [vmem:[#allocation3 + $0x8] sm:$0x1f] %v831_v56  ;;  %v681_v59 = vpop.f32.mrb[8].mxu0 }
  0xff   : > { %v761_v60 = vrot.slane %v759_v57, 7  ;;  %v766_v62 = vshrl.u32 %v2693_v58, 16  ;;  %v682_v63 = vadd.f32 %v3335_v24, %v681_v59  ;;  %v2814_v0 = vpop.f32.mrb[9].mxu0  ;;  %v769_v3 = vshll.u32 %v2693_v58, 16 }
 0x100   : > { %v684_v4 = vpop.f32.mrb[10].mxu0 }
 0x101   : > { %v764_v6 = vor.u32 %v762_v61, %v761_v60  ;;  %v768_v7 = vrot.slane %v766_v62, 7  ;;  %v708_v8 = vmax.f32 %v682_v63, 0.0  ;;  %v685_v9 = vadd.f32 %v3335_v24, %v684_v4  ;;  %v2815_v10 = vpop.f32.mrb[11].mxu0 }
 0x103   : > { %v860_v12 = vld [vmem:[#allocation3] sm:$0x1]  ;;  %v893_v13 = vld [vmem:[#allocation3] sm:$0xf0]  ;;  %v834_v14 = vsel %vm3340_vm6, %v764_v6, %v833_v2  ;;  %v771_v15 = vor.u32 %v769_v3, %v768_v7  ;;  %v2694_v16 = vpack.c.bf16 %v708_v8, %v708_v8  ;;  %v709_v17 = vmax.f32 %v685_v9, 0.0 }
 0x104   : > { %v861_v18 = vsel %vm3350_vm11, 0, %v860_v12  ;;  %v894_v19 = vsel %vm3354_vm12, 0, %v893_v13  ;;  %835 = vst [vmem:[#allocation3 + $0x10] sm:$0x1f] %v834_v14  ;;  %v845_v7 = vld [vmem:[#allocation3 + $0x30] sm:$0x1f] }
 0x105   : > { %862 = vst [vmem:[#allocation3] sm:$0x1] %v861_v18  ;;  %895 = vst [vmem:[#allocation3] sm:$0xf0] %v894_v19  ;;  %v863_v20 = vld [vmem:[#allocation3 + $0x8] sm:$0x1]  ;;  %v837_v25 = vsel %vm3340_vm6, %v771_v15, %v836_v11  ;;  %v2695_v27 = vpack.c.bf16 %v709_v17, %v709_v17 }
 0x106   : > { %v896_v21 = vld [vmem:[#allocation3 + $0x8] sm:$0xf0]  ;;  %v773_v26 = vshrl.u32 %v2694_v16, 16  ;;  %927 = vst.msk [vmem:[#allocation3] sm:$0xff] %vm611_vm3, %v3183_v28  ;;  %v864_v29 = vsel %vm3350_vm11, 0, %v863_v20  ;;  %v689_v31 = vpop.f32.mrb[12].mxu0 }
 0x107   : > { %v897_v30 = vsel %vm3354_vm12, 0, %v896_v21  ;;  %838 = vst [vmem:[#allocation3 + $0x18] sm:$0x1f] %v837_v25  ;;  %865 = vst [vmem:[#allocation3 + $0x8] sm:$0x1] %v864_v29  ;;  %v776_v33 = vshll.u32 %v2694_v16, 16  ;;  %v690_v35 = vadd.f32 %v3335_v24, %v689_v31 }
 0x108   : > { %898 = vst [vmem:[#allocation3 + $0x8] sm:$0xf0] %v897_v30  ;;  %v775_v32 = vrot.slane %v773_v26, 7  ;;  %v780_v34 = vshrl.u32 %v2695_v27, 16  ;;  %v2818_v36 = vpop.f32.mrb[13].mxu0  ;;  %v783_v38 = vshll.u32 %v2695_v27, 16 }
 0x109   : > { %v692_v39 = vpop.f32.mrb[14].mxu0  ;;  %v710_v43 = vmax.f32 %v690_v35, 0.0  ;;  %v848_v15 = vld [vmem:[#allocation3 + $0x38] sm:$0x1f]  ;;  %v1075_v16 = vsel %vm627_vm0, %v3321_v22, 0  ;;  %v1277_v17 = vsel %vm627_vm0, %v3328_v23, 0 }
 0x10a   : > { %v778_v40 = vor.u32 %v776_v33, %v775_v32  ;;  %v782_v41 = vrot.slane %v780_v34, 7  ;;  %v693_v44 = vadd.f32 %v3335_v24, %v692_v39  ;;  %v2819_v45 = vpop.f32.mrb[15].mxu0  ;;  %v3415_v29 = vld [vmem:[%s3773_s5 + $0xe] sm:$0x3] }
 0x10b   : > { %v866_v47 = vld [vmem:[#allocation3 + $0x10] sm:$0x1]  ;;  %v899_v48 = vld [vmem:[#allocation3 + $0x10] sm:$0xf0]  ;;  %v2696_v51 = vpack.c.bf16 %v710_v43, %v710_v43  ;;  %v1702_v5 = vsel %vm627_vm0, %v3415_v29, 0 }
 0x10c   : > { %v840_v49 = vsel %vm3340_vm6, %v778_v40, %v839_v37  ;;  %v785_v50 = vor.u32 %v783_v38, %v782_v41  ;;  %v711_v52 = vmax.f32 %v693_v44, 0.0  ;;  %v867_v53 = vsel %vm3350_vm11, 0, %v866_v47  ;;  %v851_v41 = vld [vmem:[#allocation3 + $0x40] sm:$0x1f] }
 0x10d   : > { %v900_v54 = vsel %vm3354_vm12, 0, %v899_v48  ;;  %841 = vst [vmem:[#allocation3 + $0x20] sm:$0x1f] %v840_v49  ;;  %868 = vst [vmem:[#allocation3 + $0x10] sm:$0x1] %v867_v53  ;;  %v787_v58 = vshrl.u32 %v2696_v51, 16 }
 0x10e   : > { %901 = vst [vmem:[#allocation3 + $0x10] sm:$0xf0] %v900_v54  ;;  %v869_v55 = vld [vmem:[#allocation3 + $0x18] sm:$0x1]  ;;  %v902_v56 = vld [vmem:[#allocation3 + $0x18] sm:$0xf0]  ;;  %v843_v57 = vsel %vm3340_vm6, %v785_v50, %v842_v46  ;;  %v2697_v59 = vpack.c.bf16 %v711_v52, %v711_v52 }
 0x10f   : > { %v870_v60 = vsel %vm3350_vm11, 0, %v869_v55  ;;  %v903_v61 = vsel %vm3354_vm12, 0, %v902_v56  ;;  %844 = vst [vmem:[#allocation3 + $0x28] sm:$0x1f] %v843_v57  ;;  %v697_v62 = vpop.f32.mrb[16].mxu0  ;;  %v3387_v63 = vld [vmem:[#allocation3 + $0x8] sm:$0xff] }
 0x110   : > { %871 = vst [vmem:[#allocation3 + $0x18] sm:$0x1] %v870_v60  ;;  %904 = vst [vmem:[#allocation3 + $0x18] sm:$0xf0] %v903_v61  ;;  %v789_v0 = vrot.slane %v787_v58, 7  ;;  %v790_v2 = vshll.u32 %v2696_v51, 16  ;;  %v698_v4 = vadd.f32 %v3335_v24, %v697_v62  ;;  %2826 = vmatprep.mubr.msk.bf16.mxu1 %vm611_vm3, %v3387_v63  ;;  %2862 = vmatprep.mubr.msk.bf16.mxu0 %vm611_vm3, %v3387_v63 }
 0x111   : > { %v794_v3 = vshrl.u32 %v2697_v59, 16  ;;  %v2822_v6 = vpop.f32.mrb[17].mxu0  ;;  %v797_v8 = vshll.u32 %v2697_v59, 16  ;;  %v854_v46 = vld [vmem:[#allocation3 + $0x48] sm:$0x1f] }
 0x112   : > { %v700_v9 = vpop.f32.mrb[18].mxu0  ;;  %v792_v10 = vor.u32 %v790_v2, %v789_v0  ;;  %v712_v12 = vmax.f32 %v698_v4, 0.0 }
 0x113   : > { %v796_v11 = vrot.slane %v794_v3, 7  ;;  %v701_v13 = vadd.f32 %v3335_v24, %v700_v9  ;;  %v2823_v14 = vpop.f32.mrb[19].mxu0  ;;  %v3404_v24 = vld [vmem:[%s3773_s5 + $0xa] sm:$0x3] }
 0x114   : > { %v872_v18 = vld [vmem:[#allocation3 + $0x20] sm:$0x1]  ;;  %v905_v19 = vld [vmem:[#allocation3 + $0x20] sm:$0xf0]  ;;  %v846_v20 = vsel %vm3340_vm6, %v792_v10, %v845_v7  ;;  %v2698_v25 = vpack.c.bf16 %v712_v12, %v712_v12  ;;  %v1379_v1 = vsel %vm627_vm0, %v3404_v24, 0 }
 0x115   : > { %v799_v21 = vor.u32 %v797_v8, %v796_v11  ;;  %v713_v26 = vmax.f32 %v701_v13, 0.0  ;;  %v873_v27 = vsel %vm3350_vm11, 0, %v872_v18  ;;  %v906_v22 = vsel %vm3354_vm12, 0, %v905_v19  ;;  %847 = vst [vmem:[#allocation3 + $0x30] sm:$0x1f] %v846_v20  ;;  %v3410_v23 = vld [vmem:[#allocation3 + $0x10] sm:$0xff] }
 0x116   : > { %874 = vst [vmem:[#allocation3 + $0x20] sm:$0x1] %v873_v27  ;;  %907 = vst [vmem:[#allocation3 + $0x20] sm:$0xf0] %v906_v22  ;;  %v875_v30 = vld [vmem:[#allocation3 + $0x28] sm:$0x1]  ;;  %2827 = vmatmul.mubr.msk.bf16.vlgmr.msra.gmra.mrb[0].mxu1 %vm611_vm3, %v3410_v23  ;;  %2863 = vmatmul.mubr.msk.bf16.vlgmr.msra.gmra.mrb[20].mxu0 %vm611_vm3, %v3410_v23 }
 0x117   : > { %v908_v31 = vld [vmem:[#allocation3 + $0x28] sm:$0xf0]  ;;  %v849_v32 = vsel %vm3340_vm6, %v799_v21, %v848_v15  ;;  %v801_v33 = vshrl.u32 %v2698_v25, 16  ;;  %v2699_v34 = vpack.c.bf16 %v713_v26, %v713_v26  ;;  %v876_v35 = vsel %vm3350_vm11, 0, %v875_v30  ;;  %2843 = vmatpush3.bf16.msra.mxu1 %v1075_v16  ;;  %v3427_v37 = vld [vmem:[#allocation3 + $0x18] sm:$0xff]  ;;  %2879 = vmatpush3.bf16.msra.mxu0 %v1277_v17  ;;  %v930_v8 = vld [vmem:[#allocation3] sm:$0xff] }
 0x118   : > { %v909_v36 = vsel %vm3354_vm12, 0, %v908_v31  ;;  %850 = vst [vmem:[#allocation3 + $0x38] sm:$0x1f] %v849_v32  ;;  %877 = vst [vmem:[#allocation3 + $0x28] sm:$0x1] %v876_v35  ;;  %v804_v39 = vshll.u32 %v2698_v25, 16  ;;  %2830 = vmatprep.mubr.msk.bf16.mxu1 %vm611_vm3, %v3427_v37  ;;  %2866 = vmatprep.mubr.msk.bf16.mxu0 %vm611_vm3, %v3427_v37 }
 0x119   : > { %910 = vst [vmem:[#allocation3 + $0x28] sm:$0xf0] %v909_v36  ;;  %v803_v38 = vrot.slane %v801_v33, 7  ;;  %v808_v40 = vshrl.u32 %v2699_v34, 16  ;;  %3114 = vmatprep.subr.msk.bf16.mxu1 %vm627_vm0, %v3404_v24  ;;  %3117 = vmatprep.subr.msk.bf16.mxu0 %vm627_vm0, %v3415_v29  ;;  %v811_v45 = vshll.u32 %v2699_v34, 16 }
 0x11a   : > { %v2637_v11 = vld [vmem:[%s3773_s5 + $0xc] sm:$0x3]  ;;  %v2655_v14 = vld [vmem:[%s3773_s5 + $0x10] sm:$0x3]  ;;  %v2146_v15 = vld [vmem:[%s3775_s7] sm:$0x3] }
 0x11b   : > { %v806_v43 = vor.u32 %v804_v39, %v803_v38  ;;  %v810_v44 = vrot.slane %v808_v40, 7  ;;  %v1584_v13 = vsel %vm627_vm0, %v2637_v11, 0  ;;  %v2172_v16 = vsel %vm627_vm0, %v2146_v15, 0  ;;  %v3622_v17 = vld [vmem:[%s3777_s9] sm:$0x3] }
 0x11c   : > { %v878_v47 = vld [vmem:[#allocation3 + $0x30] sm:$0x1]  ;;  %v911_v48 = vld [vmem:[#allocation3 + $0x30] sm:$0xf0] }
 0x11d   : > { %v852_v49 = vsel %vm3340_vm6, %v806_v43, %v851_v41  ;;  %v813_v50 = vor.u32 %v811_v45, %v810_v44  ;;  %v879_v51 = vsel %vm3350_vm11, 0, %v878_v47  ;;  %v912_v52 = vsel %vm3354_vm12, 0, %v911_v48  ;;  %v3443_v53 = vld [vmem:[#allocation3 + $0x20] sm:$0xff] }
 0x11e   : > { %853 = vst [vmem:[#allocation3 + $0x40] sm:$0x1f] %v852_v49  ;;  %880 = vst [vmem:[#allocation3 + $0x30] sm:$0x1] %v879_v51  ;;  %2831 = vmatmul.mubr.msk.bf16.gmra.mrb[4].mxu1 %vm611_vm3, %v3443_v53  ;;  %2867 = vmatmul.mubr.msk.bf16.gmra.mrb[24].mxu0 %vm611_vm3, %v3443_v53 }
 0x11f   : > { %913 = vst [vmem:[#allocation3 + $0x30] sm:$0xf0] %v912_v52  ;;  %v881_v54 = vld [vmem:[#allocation3 + $0x38] sm:$0x1]  ;;  %v914_v55 = vld [vmem:[#allocation3 + $0x38] sm:$0xf0]  ;;  %v855_v56 = vsel %vm3340_vm6, %v813_v50, %v854_v46 }
 0x120   : > { %v882_v57 = vsel %vm3350_vm11, 0, %v881_v54  ;;  %v915_v58 = vsel %vm3354_vm12, 0, %v914_v55  ;;  %856 = vst [vmem:[#allocation3 + $0x48] sm:$0x1f] %v855_v56  ;;  %v3455_v59 = vld [vmem:[#allocation3 + $0x28] sm:$0xff] }
 0x121   : > { %883 = vst [vmem:[#allocation3 + $0x38] sm:$0x1] %v882_v57  ;;  %916 = vst [vmem:[#allocation3 + $0x38] sm:$0xf0] %v915_v58  ;;  %2834 = vmatprep.mubr.msk.bf16.mxu1 %vm611_vm3, %v3455_v59  ;;  %2870 = vmatprep.mubr.msk.bf16.mxu0 %vm611_vm3, %v3455_v59 }
 0x125   : > { %v884_v42 = vld [vmem:[#allocation3 + $0x40] sm:$0x1]  ;;  %v917_v60 = vld [vmem:[#allocation3 + $0x40] sm:$0xf0] }
 0x126   : > { %v885_v61 = vsel %vm3350_vm11, 0, %v884_v42  ;;  %v918_v62 = vsel %vm3354_vm12, 0, %v917_v60  ;;  %v3465_v0 = vld [vmem:[#allocation3 + $0x30] sm:$0xff] }
 0x127   : > { %886 = vst [vmem:[#allocation3 + $0x40] sm:$0x1] %v885_v61  ;;  %919 = vst [vmem:[#allocation3 + $0x40] sm:$0xf0] %v918_v62  ;;  %v887_v2 = vld [vmem:[#allocation3 + $0x48] sm:$0x1]  ;;  %2835 = vmatmul.mubr.msk.bf16.gmra.mrb[8].mxu1 %vm611_vm3, %v3465_v0  ;;  %2871 = vmatmul.mubr.msk.bf16.gmra.mrb[28].mxu0 %vm611_vm3, %v3465_v0 }
 0x128   : > { %v920_v3 = vld [vmem:[#allocation3 + $0x48] sm:$0xf0]  ;;  %v888_v4 = vsel %vm3350_vm11, 0, %v887_v2  ;;  %v3475_v7 = vld [vmem:[#allocation3 + $0x38] sm:$0xff] }
 0x129   : > { %v921_v6 = vsel %vm3354_vm12, 0, %v920_v3  ;;  %889 = vst [vmem:[#allocation3 + $0x48] sm:$0x1] %v888_v4  ;;  %2838 = vmatprep.mubr.msk.bf16.mxu1 %vm611_vm3, %v3475_v7  ;;  %2874 = vmatprep.mubr.msk.bf16.mxu0 %vm611_vm3, %v3475_v7 }
 0x12a   : > { %922 = vst [vmem:[#allocation3 + $0x48] sm:$0xf0] %v921_v6 }
 0x12b   : > { %929 = vst.msk [vmem:[#allocation3 + $0x48] sm:$0xff] %vm611_vm3, %v3183_v28  ;;  %v2585_v28 = vld [vmem:[%s3773_s5 + $0x4] sm:$0x3] }
 0x12c   : > { %v1479_v10 = vsel %vm627_vm0, %v2585_v28, 0 }
 0x12e   : > { %v3483_v9 = vld [vmem:[#allocation3 + $0x40] sm:$0xff] }
 0x12f   : > { %2839 = vmatmul.mubr.msk.bf16.gmra.mrb[12].mxu1 %vm611_vm3, %v3483_v9  ;;  %2875 = vmatmul.mubr.msk.bf16.gmra.mrb[32].mxu0 %vm611_vm3, %v3483_v9 }
 0x130   : > { %2844 = vmatprep.mubr.msk.bf16.mxu1 %vm611_vm3, %v930_v8  ;;  %2880 = vmatprep.mubr.msk.bf16.mxu0 %vm611_vm3, %v930_v8 }
 0x132   : > { %v939_v12 = vld [vmem:[#allocation3 + $0x48] sm:$0xff] }
 0x137   : > { %2845 = vmatmul.mubr.msk.bf16.vlgmr.msra.gmra.mrb[0].mxu1 %vm611_vm3, %v3387_v63  ;;  %2881 = vmatmul.mubr.msk.bf16.vlgmr.msra.gmra.mrb[20].mxu0 %vm611_vm3, %v3387_v63 }
 0x138   : > { %2897 = vmatpush3.bf16.msra.mxu1 %v1379_v1  ;;  %2848 = vmatprep.mubr.msk.bf16.mxu1 %vm611_vm3, %v3410_v23 }
 0x139   : > { %2884 = vmatprep.mubr.msk.bf16.mxu0 %vm611_vm3, %v3410_v23  ;;  %2951 = vmatpush3.bf16.msra.mxu0 %v1702_v5 }
 0x13a   : > { %3115 = vmatprep.subr.msk.bf16.mxu1 %vm627_vm0, %v2585_v28  ;;  %3119 = vmatprep.subr.msk.bf16.mxu0 %vm627_vm0, %v2146_v15 }
 0x13f   : > { %2849 = vmatmul.mubr.msk.bf16.gmra.mrb[4].mxu1 %vm611_vm3, %v3427_v37  ;;  %2885 = vmatmul.mubr.msk.bf16.gmra.mrb[24].mxu0 %vm611_vm3, %v3427_v37 }
 0x140   : > { %2852 = vmatprep.mubr.msk.bf16.mxu1 %vm611_vm3, %v3443_v53  ;;  %2888 = vmatprep.mubr.msk.bf16.mxu0 %vm611_vm3, %v3443_v53 }
 0x147   : > { %2853 = vmatmul.mubr.msk.bf16.gmra.mrb[8].mxu1 %vm611_vm3, %v3455_v59  ;;  %2889 = vmatmul.mubr.msk.bf16.gmra.mrb[28].mxu0 %vm611_vm3, %v3455_v59 }
 0x148   : > { %2856 = vmatprep.mubr.msk.bf16.mxu1 %vm611_vm3, %v3465_v0  ;;  %2892 = vmatprep.mubr.msk.bf16.mxu0 %vm611_vm3, %v3465_v0 }
 0x14f   : > { %2857 = vmatmul.mubr.msk.bf16.gmra.mrb[12].mxu1 %vm611_vm3, %v3475_v7  ;;  %2893 = vmatmul.mubr.msk.bf16.gmra.mrb[32].mxu0 %vm611_vm3, %v3475_v7 }
 0x150   : > { %2898 = vmatprep.mubr.msk.bf16.mxu1 %vm611_vm3, %v3387_v63  ;;  %2952 = vmatprep.mubr.msk.bf16.mxu0 %vm611_vm3, %v3410_v23 }
 0x157   : > { %2899 = vmatmul.mubr.msk.bf16.vlgmr.msra.gmra.mrb[16].mxu1 %vm611_vm3, %v3410_v23  ;;  %2953 = vmatmul.mubr.msk.bf16.vlgmr.msra.gmra.mrb[20].mxu0 %vm611_vm3, %v3427_v37 }
 0x158   : > { %2915 = vmatpush3.bf16.msra.mxu1 %v1479_v10  ;;  %2902 = vmatprep.mubr.msk.bf16.mxu1 %vm611_vm3, %v3427_v37 }
 0x159   : > { %2956 = vmatprep.mubr.msk.bf16.mxu0 %vm611_vm3, %v3443_v53  ;;  %3116 = vmatprep.subr.msk.bf16.mxu1 %vm627_vm0, %v2637_v11 }
 0x15a   : > { %2987 = vmatpush3.bf16.msra.mxu0 %v2172_v16 }
 0x15b   : > { %3120 = vmatprep.subr.msk.bf16.mxu0 %vm627_vm0, %v3622_v17 }
 0x15f   : > { %2903 = vmatmul.mubr.msk.bf16.gmra.mrb[20].mxu1 %vm611_vm3, %v3443_v53  ;;  %2957 = vmatmul.mubr.msk.bf16.gmra.mrb[24].mxu0 %vm611_vm3, %v3455_v59 }
 0x160   : > { %2906 = vmatprep.mubr.msk.bf16.mxu1 %vm611_vm3, %v3455_v59  ;;  %2960 = vmatprep.mubr.msk.bf16.mxu0 %vm611_vm3, %v3465_v0 }
 0x167   : > { %2907 = vmatmul.mubr.msk.bf16.gmra.mrb[24].mxu1 %vm611_vm3, %v3465_v0  ;;  %2961 = vmatmul.mubr.msk.bf16.gmra.mrb[28].mxu0 %vm611_vm3, %v3475_v7 }
 0x168   : > { %2910 = vmatprep.mubr.msk.bf16.mxu1 %vm611_vm3, %v3475_v7  ;;  %2964 = vmatprep.mubr.msk.bf16.mxu0 %vm611_vm3, %v3483_v9 }
 0x16f   : > { %2911 = vmatmul.mubr.msk.bf16.gmra.mrb[28].mxu1 %vm611_vm3, %v3483_v9  ;;  %2965 = vmatmul.mubr.msk.bf16.gmra.mrb[32].mxu0 %vm611_vm3, %v939_v12 }
 0x170   : > { %2916 = vmatprep.mubr.msk.bf16.mxu1 %vm611_vm3, %v930_v8 }
 0x177   : > { %2917 = vmatmul.mubr.msk.bf16.vlgmr.msra.gmra.mrb[16].mxu1 %vm611_vm3, %v3387_v63  ;;  %v1820_v63 = vsel %vm627_vm0, %v2655_v14, 0 }
 0x178   : > { %2933 = vmatpush3.bf16.msra.mxu1 %v1584_v13  ;;  %2920 = vmatprep.mubr.msk.bf16.mxu1 %vm611_vm3, %v3410_v23 }
 0x179   : > { %3118 = vmatprep.subr.msk.bf16.mxu1 %vm627_vm0, %v2655_v14 }
 0x17f   : > { %2921 = vmatmul.mubr.msk.bf16.gmra.mrb[20].mxu1 %vm611_vm3, %v3427_v37 }
 0x180   : > { %2924 = vmatprep.mubr.msk.bf16.mxu1 %vm611_vm3, %v3443_v53 }
 0x187   : > { %2925 = vmatmul.mubr.msk.bf16.gmra.mrb[24].mxu1 %vm611_vm3, %v3455_v59 }
 0x188   : > { %2928 = vmatprep.mubr.msk.bf16.mxu1 %vm611_vm3, %v3465_v0 }
 0x18f   : > { %2929 = vmatmul.mubr.msk.bf16.gmra.mrb[28].mxu1 %vm611_vm3, %v3475_v7 }
 0x190   : > { %2934 = vmatprep.mubr.msk.bf16.mxu1 %vm611_vm3, %v3410_v23 }
 0x197   : > { %2935 = vmatmul.mubr.msk.bf16.vlgmr.msra.gmra.mrb[0].mxu1 %vm611_vm3, %v3427_v37 }
 0x198   : > { %2969 = vmatpush3.bf16.msra.mxu1 %v1820_v63  ;;  %2938 = vmatprep.mubr.msk.bf16.mxu1 %vm611_vm3, %v3443_v53 }
 0x19f   : > { %2939 = vmatmul.mubr.msk.bf16.gmra.mrb[4].mxu1 %vm611_vm3, %v3455_v59 }
 0x1a0   : > { %2942 = vmatprep.mubr.msk.bf16.mxu1 %vm611_vm3, %v3465_v0 }
 0x1a7   : > { %2943 = vmatmul.mubr.msk.bf16.gmra.mrb[8].mxu1 %vm611_vm3, %v3475_v7 }
 0x1a8   : > { %2946 = vmatprep.mubr.msk.bf16.mxu1 %vm611_vm3, %v3483_v9 }
 0x1af   : > { %2947 = vmatmul.mubr.msk.bf16.gmra.mrb[12].mxu1 %vm611_vm3, %v939_v12 }
 0x1b0   : > { %2970 = vmatprep.mubr.msk.bf16.mxu1 %vm611_vm3, %v3410_v23 }
 0x1b7   : > { %2971 = vmatmul.mubr.msk.bf16.vlgmr.msra.gmra.mrb[16].mxu1 %vm611_vm3, %v3427_v37 }
 0x1b8   : > { %2974 = vmatprep.mubr.msk.bf16.mxu1 %vm611_vm3, %v3443_v53 }
 0x1bf   : > { %2975 = vmatmul.mubr.msk.bf16.gmra.mrb[20].mxu1 %vm611_vm3, %v3455_v59 }
 0x1c0   : > { %2978 = vmatprep.mubr.msk.bf16.mxu1 %vm611_vm3, %v3465_v0 }
 0x1c7   : > { %2979 = vmatmul.mubr.msk.bf16.gmra.mrb[24].mxu1 %vm611_vm3, %v3475_v7 }
 0x1c8   : > { %2982 = vmatprep.mubr.msk.bf16.mxu1 %vm611_vm3, %v3483_v9 }
 0x1cf   : > { %2983 = vmatmul.mubr.msk.bf16.gmra.mrb[28].mxu1 %vm611_vm3, %v939_v12 }
 0x22a   : > { %v2954_v18 = vpop.f32.mrb[20].mxu0 }
 0x22b   : > { %v1738_v19 = vpop.f32.mrb[21].mxu0  ;;  %v1955_v21 = vrot.slane %v2954_v18, 1 }
 0x22c   : > { %v2955_v20 = vpop.f32.mrb[22].mxu0  ;;  %v1952_v24 = vrot.slane %v1738_v19, 1 }
 0x22d   : > { %v1957_v25 = vrot.slane %v2955_v20, 1  ;;  %v1741_v26 = vpop.f32.mrb[23].mxu0 }
 0x22e   : > { %v1953_v27 = vrot.slane %v1741_v26, 1 }
 0x22f   : > { %v1958_v22 = vsel %vm1951_vm13, %v1955_v21, %v1957_v25 }
 0x230   : > { %v1954_v23 = vsel %vm1951_vm13, %v1952_v24, %v1953_v27  ;;  %v1956_v29 = vsel %vm1951_vm13, %v1953_v27, %v1955_v21 }
 0x232   : > { %v2958_v30 = vpop.f32.mrb[24].mxu0 }
 0x233   : > { %v1754_v31 = vpop.f32.mrb[25].mxu0  ;;  %v1963_v34 = vrot.slane %v2958_v30, 1 }
 0x234   : > { %v1959_v32 = vrot.slane %v1754_v31, 1  ;;  %v2959_v33 = vpop.f32.mrb[26].mxu0 }
 0x235   : > { %v1965_v35 = vrot.slane %v2959_v33, 1  ;;  %v1757_v36 = vpop.f32.mrb[27].mxu0 }
 0x236   : > { %v1961_v37 = vrot.slane %v1757_v36, 1  ;;  %v1960_v38 = vsel %vm1951_vm13, %v1957_v25, %v1959_v32 }
 0x237   : > { %v1966_v39 = vsel %vm1951_vm13, %v1963_v34, %v1965_v35 }
 0x238   : > { %v1962_v40 = vsel %vm1951_vm13, %v1959_v32, %v1961_v37  ;;  %v1964_v41 = vsel %vm1951_vm13, %v1961_v37, %v1963_v34 }
 0x23a   : > { %v2962_v43 = vpop.f32.mrb[28].mxu0 }
 0x23b   : > { %v1770_v44 = vpop.f32.mrb[29].mxu0  ;;  %v1971_v47 = vrot.slane %v2962_v43, 1 }
 0x23c   : > { %v1967_v45 = vrot.slane %v1770_v44, 1  ;;  %v2963_v46 = vpop.f32.mrb[30].mxu0 }
 0x23d   : > { %v1973_v48 = vrot.slane %v2963_v46, 1  ;;  %v1773_v49 = vpop.f32.mrb[31].mxu0 }
 0x23e   : > { %v1969_v50 = vrot.slane %v1773_v49, 1  ;;  %v1968_v51 = vsel %vm1951_vm13, %v1965_v35, %v1967_v45 }
 0x23f   : > { %v1974_v52 = vsel %vm1951_vm13, %v1971_v47, %v1973_v48 }
 0x240   : > { %v1970_v53 = vsel %vm1951_vm13, %v1967_v45, %v1969_v50  ;;  %v1972_v54 = vsel %vm1951_vm13, %v1969_v50, %v1971_v47  ;;  %v3667_v47 = vld [vmem:[%s3774_s6] ss:$0 sm:$0xff] }
 0x242   : > { %v2966_v55 = vpop.f32.mrb[32].mxu0 }
 0x243   : > { %v1786_v56 = vpop.f32.mrb[33].mxu0  ;;  %v1979_v59 = vrot.slane %v2966_v55, 1 }
 0x244   : > { %v1975_v57 = vrot.slane %v1786_v56, 1  ;;  %v2967_v58 = vpop.f32.mrb[34].mxu0 }
 0x245   : > { %v1981_v42 = vrot.slane %v2967_v58, 1  ;;  %v1789_v60 = vpop.f32.mrb[35].mxu0 }
 0x246   : > { %v1977_v61 = vrot.slane %v1789_v60, 1  ;;  %v1976_v62 = vsel %vm1951_vm13, %v1973_v48, %v1975_v57 }
 0x247   : > { %v1982_v0 = vsel %vm1951_vm13, %v1979_v59, %v1981_v42  ;;  %v2000_v2 = vsel %vm1951_vm13, %v1981_v42, %v1952_v24 }
 0x248   : > { %v1978_v3 = vsel %vm1951_vm13, %v1975_v57, %v1977_v61  ;;  %v1980_v4 = vsel %vm1951_vm13, %v1977_v61, %v1979_v59 }
 0x26a   : > { %v2936_v6 = vpop.f32.mrb[0].mxu1 }
 0x26b   : > { %v2003_v7 = vadd.f32 %v2936_v6, %v1958_v22  ;;  %v1620_v8 = vpop.f32.mrb[1].mxu1 }
 0x26c   : > { %v2001_v9 = vadd.f32 %v1954_v23, %v1620_v8  ;;  %v2937_v1 = vpop.f32.mrb[2].mxu1 }
 0x26d   : > { %v2004_v5 = vadd.f32 %v2937_v1, %v1960_v38  ;;  %v1623_v28 = vpop.f32.mrb[3].mxu1 }
 0x26e   : > { %v2002_v10 = vadd.f32 %v1956_v29, %v1623_v28 }
 0x272   : > { %v2940_v11 = vpop.f32.mrb[4].mxu1 }
 0x273   : > { %v2007_v12 = vadd.f32 %v2940_v11, %v1966_v39  ;;  %v1636_v13 = vpop.f32.mrb[5].mxu1 }
 0x274   : > { %v2005_v14 = vadd.f32 %v1962_v40, %v1636_v13  ;;  %v2941_v63 = vpop.f32.mrb[6].mxu1 }
 0x275   : > { %v3642_v15 = vadd.f32 %v2941_v63, %v1968_v51  ;;  %v1639_v16 = vpop.f32.mrb[7].mxu1 }
 0x276   : > { %v2006_v18 = vadd.f32 %v1964_v41, %v1639_v16 }
 0x27a   : > { %v2944_v19 = vpop.f32.mrb[8].mxu1 }
 0x27b   : > { %v3644_v20 = vadd.f32 %v2944_v19, %v1974_v52  ;;  %v1652_v21 = vpop.f32.mrb[9].mxu1 }
 0x27c   : > { %v3646_v25 = vadd.f32 %v1970_v53, %v1652_v21  ;;  %v2945_v26 = vpop.f32.mrb[10].mxu1 }
 0x27d   : > { %v3648_v24 = vadd.f32 %v2945_v26, %v1976_v62  ;;  %v1655_v27 = vpop.f32.mrb[11].mxu1 }
 0x27e   : > { %v3650_v22 = vadd.f32 %v1972_v54, %v1655_v27  ;;  %v2305_v27 = vsel %vm627_vm0, %v3622_v17, 0 }
 0x282   : > { %v2948_v23 = vpop.f32.mrb[12].mxu1 }
 0x283   : > { %v3652_v29 = vadd.f32 %v2948_v23, %v1982_v0  ;;  %v1668_v30 = vpop.f32.mrb[13].mxu1 }
 0x284   : > { %v3654_v31 = vadd.f32 %v1978_v3, %v1668_v30  ;;  %v2949_v32 = vpop.f32.mrb[14].mxu1 }
 0x285   : > { %v3656_v33 = vadd.f32 %v2949_v32, %v2000_v2  ;;  %v1671_v34 = vpop.f32.mrb[15].mxu1 }
 0x286   : > { %v3658_v35 = vadd.f32 %v1980_v4, %v1671_v34 }
 0x28a   : > { %v2972_v36 = vpop.f32.mrb[16].mxu1 }
 0x28b   : > { %v3660_v37 = vpop.f32.mrb[17].mxu1  ;;  %v2037_v39 = vrot.slane %v2972_v36, 2 }
 0x28c   : > { %v2973_v38 = vpop.f32.mrb[18].mxu1  ;;  %v2034_v43 = vrot.slane %v3660_v37, 2 }
 0x28d   : > { %v2039_v40 = vrot.slane %v2973_v38, 2  ;;  %v1859_v41 = vpop.f32.mrb[19].mxu1 }
 0x28e   : > { %v2035_v44 = vrot.slane %v1859_v41, 2 }
 0x28f   : > { %v2040_v45 = vsel %vm2033_vm14, %v2037_v39, %v2039_v40 }
 0x290   : > { %v2085_v46 = vadd.f32 %v2040_v45, %v2003_v7  ;;  %v2036_v48 = vsel %vm2033_vm14, %v2034_v43, %v2035_v44  ;;  %v2038_v49 = vsel %vm2033_vm14, %v2035_v44, %v2037_v39 }
 0x291   : > { %v2083_v50 = vadd.f32 %v2036_v48, %v2001_v9  ;;  %v2084_v51 = vadd.f32 %v2038_v49, %v2002_v10 }
 0x292   : > { %v2976_v52 = vpop.f32.mrb[20].mxu1  ;;  %v2108_v2 = vadd.f32 %v3667_v47, %v2085_v46 }
 0x293   : > { %v2106_v53 = vadd.f32 %v3667_v47, %v2083_v50  ;;  %v2107_v54 = vadd.f32 %v3667_v47, %v2084_v51  ;;  %v1872_v55 = vpop.f32.mrb[21].mxu1  ;;  %v2045_v42 = vrot.slane %v2976_v52, 2 }
 0x294   : > { %v2041_v56 = vrot.slane %v1872_v55, 2  ;;  %v2977_v57 = vpop.f32.mrb[22].mxu1  ;;  %v2124_v13 = vmax.f32 %v2108_v2, 0.0 }
 0x295   : > { %v2122_v58 = vmax.f32 %v2106_v53, 0.0  ;;  %v2123_v59 = vmax.f32 %v2107_v54, 0.0  ;;  %v2047_v60 = vrot.slane %v2977_v57, 2  ;;  %v1875_v61 = vpop.f32.mrb[23].mxu1 }
 0x296   : > { %v2042_v62 = vsel %vm2033_vm14, %v2039_v40, %v2041_v56  ;;  %v2043_v0 = vrot.slane %v1875_v61, 2 }
 0x297   : > { %v2086_v3 = vadd.f32 %v2042_v62, %v2004_v5  ;;  %v2048_v4 = vsel %vm2033_vm14, %v2045_v42, %v2047_v60  ;;  %v2138_v6 = vpack.c.bf16 %v2123_v59, %v2122_v58 }
 0x298   : > { %v2089_v7 = vadd.f32 %v2048_v4, %v2007_v12  ;;  %v2044_v8 = vsel %vm2033_vm14, %v2041_v56, %v2043_v0  ;;  %v2046_v9 = vsel %vm2033_vm14, %v2043_v0, %v2045_v42 }
 0x299   : > { %v2109_v1 = vadd.f32 %v3667_v47, %v2086_v3  ;;  %v2087_v28 = vadd.f32 %v2044_v8, %v2005_v14  ;;  %v2088_v10 = vadd.f32 %v2046_v9, %v2006_v18  ;;  %2988 = vmatprep.mubr.msk.bf16.mxu0 %vm611_vm3, %v2138_v6 }
 0x29a   : > { %v2980_v11 = vpop.f32.mrb[24].mxu1  ;;  %v2112_v38 = vadd.f32 %v3667_v47, %v2089_v7 }
 0x29b   : > { %v2125_v63 = vmax.f32 %v2109_v1, 0.0  ;;  %v2110_v16 = vadd.f32 %v3667_v47, %v2087_v28  ;;  %v2111_v5 = vadd.f32 %v3667_v47, %v2088_v10  ;;  %v1888_v19 = vpop.f32.mrb[25].mxu1  ;;  %v2053_v21 = vrot.slane %v2980_v11, 2 }
 0x29c   : > { %v2049_v12 = vrot.slane %v1888_v19, 2  ;;  %v2981_v26 = vpop.f32.mrb[26].mxu1  ;;  %v2128_v50 = vmax.f32 %v2112_v38, 0.0  ;;  %v3153_v19 = vld [vmem:[%s3276_s29] sm:$0xff]  }
 0x29d   : > { %v2139_v23 = vpack.c.bf16 %v2125_v63, %v2124_v13  ;;  %v2126_v30 = vmax.f32 %v2110_v16, 0.0  ;;  %v2127_v14 = vmax.f32 %v2111_v5, 0.0  ;;  %v2055_v18 = vrot.slane %v2981_v26, 2  ;;  %v1891_v32 = vpop.f32.mrb[27].mxu1 }
 0x29e   : > { %v2050_v34 = vsel %vm2033_vm14, %v2047_v60, %v2049_v12  ;;  %v2051_v36 = vrot.slane %v1891_v32, 2 }
 0x29f   : > { %v2090_v39 = vadd.f32 %v2050_v34, %v3642_v15  ;;  %v2056_v40 = vsel %vm2033_vm14, %v2053_v21, %v2055_v18  ;;  %2989 = vmatmul.mubr.msk.bf16.vlgmr.msra.gmra.mrb[36].mxu0 %vm611_vm3, %v2139_v23  ;;  %v2140_v41 = vpack.c.bf16 %v2127_v14, %v2126_v30 }
 0x2a0   : > { %v2093_v44 = vadd.f32 %v2056_v40, %v3644_v20  ;;  %v2052_v17 = vsel %vm2033_vm14, %v2049_v12, %v2051_v36  ;;  %v2054_v45 = vsel %vm2033_vm14, %v2051_v36, %v2053_v21  ;;  %3005 = vmatpush3.bf16.msra.mxu0 %v2305_v27  ;;  %v3154_v21 = vld [vmem:[%s3276_s29 + $0x8] sm:$0xff]   ;;  %v3155_v12 = vld [vmem:[%s3276_s29 + $0x10] sm:$0xff]  }
 0x2a1   : > { %v2113_v46 = vadd.f32 %v3667_v47, %v2090_v39  ;;  %v2091_v48 = vadd.f32 %v2052_v17, %v3646_v25  ;;  %v2092_v49 = vadd.f32 %v2054_v45, %v3650_v22  ;;  %2992 = vmatprep.mubr.msk.bf16.mxu0 %vm611_vm3, %v2140_v41 }
 0x2a2   : > { %v2984_v15 = vpop.f32.mrb[28].mxu1  ;;  %v2116_v22 = vadd.f32 %v3667_v47, %v2093_v44 }
 0x2a3   : > { %v2129_v51 = vmax.f32 %v2113_v46, 0.0  ;;  %v2114_v52 = vadd.f32 %v3667_v47, %v2091_v48  ;;  %v2115_v20 = vadd.f32 %v3667_v47, %v2092_v49  ;;  %v1904_v53 = vpop.f32.mrb[29].mxu1  ;;  %v2061_v54 = vrot.slane %v2984_v15, 2  ;;  %v2681_v46 = vld [vmem:[%s3776_s8] ss:$0 sm:$0xff] }
 0x2a4   : > { %v2057_v55 = vrot.slane %v1904_v53, 2  ;;  %v2985_v56 = vpop.f32.mrb[30].mxu1 }
 0x2a5   : > { %v2130_v57 = vmax.f32 %v2114_v52, 0.0  ;;  %v2131_v58 = vmax.f32 %v2115_v20, 0.0  ;;  %v2063_v59 = vrot.slane %v2985_v56, 2  ;;  %v1907_v42 = vpop.f32.mrb[31].mxu1  ;;  %v2141_v25 = vpack.c.bf16 %v2129_v51, %v2128_v50  ;;  %v2682_v50 = vld [vmem:[%s3778_s10] ss:$0 sm:$0xff] }
 0x2a6   : > { %v2058_v60 = vsel %vm2033_vm14, %v2055_v18, %v2057_v55  ;;  %v2059_v61 = vrot.slane %v1907_v42, 2 }
 0x2a7   : > { %v2094_v62 = vadd.f32 %v2058_v60, %v3648_v24  ;;  %v2064_v0 = vsel %vm2033_vm14, %v2061_v54, %v2063_v59  ;;  %v2082_v2 = vsel %vm2033_vm14, %v2063_v59, %v2034_v43  ;;  %2993 = vmatmul.mubr.msk.bf16.gmra.mrb[40].mxu0 %vm611_vm3, %v2141_v25  ;;  %v2142_v3 = vpack.c.bf16 %v2131_v58, %v2130_v57 }
 0x2a8   : > { %v2097_v4 = vadd.f32 %v2064_v0, %v3652_v29  ;;  %v2098_v6 = vadd.f32 %v2082_v2, %v3656_v33  ;;  %v2060_v7 = vsel %vm2033_vm14, %v2057_v55, %v2059_v61  ;;  %v2062_v8 = vsel %vm2033_vm14, %v2059_v61, %v2061_v54 }
 0x2a9   : > { %v2117_v9 = vadd.f32 %v3667_v47, %v2094_v62  ;;  %v2095_v24 = vadd.f32 %v2060_v7, %v3654_v31  ;;  %v2096_v1 = vadd.f32 %v2062_v8, %v3658_v35  ;;  %2996 = vmatprep.mubr.msk.bf16.mxu0 %vm611_vm3, %v2142_v3  ;;  %v2132_v29 = vmax.f32 %v2116_v22, 0.0 }
 0x2aa   : > { %v2120_v37 = vadd.f32 %v3667_v47, %v2097_v4  ;;  %v2121_v43 = vadd.f32 %v3667_v47, %v2098_v6 }
 0x2ab   : > { %v2133_v33 = vmax.f32 %v2117_v9, 0.0  ;;  %v2118_v28 = vadd.f32 %v3667_v47, %v2095_v24  ;;  %v2119_v10 = vadd.f32 %v3667_v47, %v2096_v1  ;;  %v3156_v47 = vld [vmem:[%s3276_s29 + $0x18] sm:$0xff]  }
 0x2ac   : > { %v2136_v11 = vmax.f32 %v2120_v37, 0.0  ;;  %v2137_v31 = vmax.f32 %v2121_v43, 0.0 }
 0x2ad   : > { %v2134_v13 = vmax.f32 %v2118_v28, 0.0  ;;  %v2135_v35 = vmax.f32 %v2119_v10, 0.0  ;;  %v2143_v63 = vpack.c.bf16 %v2133_v33, %v2132_v29 }
 0x2ae   : > { %v2145_v16 = vpack.c.bf16 %v2137_v31, %v2136_v11 }
 0x2af   : > { %2997 = vmatmul.mubr.msk.bf16.gmra.mrb[44].mxu0 %vm611_vm3, %v2143_v63  ;;  %v2144_v5 = vpack.c.bf16 %v2135_v35, %v2134_v13 }
 0x2b1   : > { %3000 = vmatprep.mubr.msk.bf16.mxu0 %vm611_vm3, %v2144_v5 }
 0x2b7   : > { %3001 = vmatmul.mubr.msk.bf16.gmra.mrb[48].mxu0 %vm611_vm3, %v2145_v16 }
 0x2b8   : > { %3006 = vmatprep.mubr.msk.bf16.mxu0 %vm611_vm3, %v3153_v19 }
 0x2bf   : > { %3007 = vmatmul.mubr.msk.bf16.vlgmr.msra.gmra.mrb[52].mxu0 %vm611_vm3, %v3154_v21 }
 0x2c0   : > { %3010 = vmatprep.mubr.msk.bf16.mxu0 %vm611_vm3, %v3155_v12 }
 0x2c7   : > { %3011 = vmatmul.mubr.msk.bf16.gmra.mrb[56].mxu0 %vm611_vm3, %v3156_v47 }
 0x372   : > { %v2990_v26 = vpop.f32.mrb[36].mxu0 }
 0x373   : > { %v2208_v27 = vpop.f32.mrb[37].mxu0  ;;  %v2380_v53 = vadd.f32 %v2990_v26, %v2681_v46 }
 0x374   : > { %v2991_v23 = vpop.f32.mrb[38].mxu0  ;;  %v2379_v49 = vadd.f32 %v2681_v46, %v2208_v27 }
 0x375   : > { %v2211_v30 = vpop.f32.mrb[39].mxu0 }
 0x37a   : > { %v2994_v14 = vpop.f32.mrb[40].mxu0 }
 0x37b   : > { %v2222_v18 = vpop.f32.mrb[41].mxu0  ;;  %v2382_v51 = vadd.f32 %v2994_v14, %v2681_v46 }
 0x37c   : > { %v2995_v32 = vpop.f32.mrb[42].mxu0  ;;  %v2381_v48 = vadd.f32 %v2681_v46, %v2222_v18 }
 0x37d   : > { %v2225_v34 = vpop.f32.mrb[43].mxu0 }
 0x382   : > { %v2998_v36 = vpop.f32.mrb[44].mxu0 }
 0x383   : > { %v2236_v38 = vpop.f32.mrb[45].mxu0  ;;  %v2384_v9 = vadd.f32 %v2998_v36, %v2681_v46 }
 0x384   : > { %v2999_v39 = vpop.f32.mrb[46].mxu0  ;;  %v2383_v2 = vadd.f32 %v2681_v46, %v2236_v38 }
 0x385   : > { %v2239_v40 = vpop.f32.mrb[47].mxu0 }
 0x38a   : > { %v3002_v41 = vpop.f32.mrb[48].mxu0 }
 0x38b   : > { %v2250_v44 = vpop.f32.mrb[49].mxu0  ;;  %v2386_v6 = vadd.f32 %v3002_v41, %v2681_v46 }
 0x38c   : > { %v3003_v17 = vpop.f32.mrb[50].mxu0  ;;  %v2385_v62 = vadd.f32 %v2681_v46, %v2250_v44 }
 0x38d   : > { %v2253_v45 = vpop.f32.mrb[51].mxu0 }
 0x392   : > { %v3008_v15 = vpop.f32.mrb[52].mxu0 }
 0x393   : > { %v2389_v52 = vadd.f32 %v3008_v15, %v2381_v48  ;;  %v2341_v20 = vpop.f32.mrb[53].mxu0 }
 0x394   : > { %v2387_v54 = vadd.f32 %v2379_v49, %v2341_v20  ;;  %v3009_v55 = vpop.f32.mrb[54].mxu0 }
 0x395   : > { %v2404_v56 = vadd.f32 %v2682_v50, %v2389_v52  ;;  %v2390_v57 = vadd.f32 %v3009_v55, %v2382_v51  ;;  %v2344_v58 = vpop.f32.mrb[55].mxu0 }
 0x396   : > { %v2402_v59 = vadd.f32 %v2682_v50, %v2387_v54  ;;  %v2388_v42 = vadd.f32 %v2380_v53, %v2344_v58 }
 0x397   : > { %v2412_v25 = vmax.f32 %v2404_v56, 0.0  ;;  %v2405_v22 = vadd.f32 %v2682_v50, %v2390_v57 }
 0x398   : > { %v2410_v60 = vmax.f32 %v2402_v59, 0.0  ;;  %v2403_v61 = vadd.f32 %v2682_v50, %v2388_v42 }
 0x399   : > { %2421 = vst.msk [vmem:[%s3741_s23 + $0x10] sm:$0xff] %vm2418_vm15, %v2412_v25  ;;  %v2413_v0 = vmax.f32 %v2405_v22, 0.0 }
 0x39a   : > { %2419 = vst.msk [vmem:[%s3741_s23] sm:$0xff] %vm2418_vm15, %v2410_v60  ;;  %v2411_v3 = vmax.f32 %v2403_v61, 0.0  ;;  %v3012_v4 = vpop.f32.mrb[56].mxu0 }
 0x39b   : > { %2422 = vst.msk [vmem:[%s3741_s23 + $0x18] sm:$0xff] %vm2418_vm15, %v2413_v0  ;;  %v2393_v7 = vadd.f32 %v3012_v4, %v2385_v62  ;;  %v2357_v8 = vpop.f32.mrb[57].mxu0 }
 0x39c   : > { %2420 = vst.msk [vmem:[%s3741_s23 + $0x8] sm:$0xff] %vm2418_vm15, %v2411_v3  ;;  %v2391_v24 = vadd.f32 %v2383_v2, %v2357_v8  ;;  %v3013_v1 = vpop.f32.mrb[58].mxu0 }
 0x39d   : > { %v2408_v37 = vadd.f32 %v2682_v50, %v2393_v7  ;;  %v2394_v43 = vadd.f32 %v3013_v1, %v2386_v6  ;;  %v2360_v29 = vpop.f32.mrb[59].mxu0 }
 0x39e   : > { %v2406_v33 = vadd.f32 %v2682_v50, %v2391_v24  ;;  %v2392_v28 = vadd.f32 %v2384_v9, %v2360_v29 }
 0x39f   : > { %v2416_v10 = vmax.f32 %v2408_v37, 0.0  ;;  %v2409_v11 = vadd.f32 %v2682_v50, %v2394_v43 }
 0x3a0   : > { %v2414_v31 = vmax.f32 %v2406_v33, 0.0  ;;  %v2407_v13 = vadd.f32 %v2682_v50, %v2392_v28 }
 0x3a1   : > { %2425 = vst.msk [vmem:[%s3741_s23 + $0x30] sm:$0xff] %vm2418_vm15, %v2416_v10  ;;  %v2417_v35 = vmax.f32 %v2409_v11, 0.0 }
 0x3a2   : > { %2423 = vst.msk [vmem:[%s3741_s23 + $0x20] sm:$0xff] %vm2418_vm15, %v2414_v31  ;;  %v2415_v63 = vmax.f32 %v2407_v13, 0.0 }
 0x3a3   : > { %2426 = vst.msk [vmem:[%s3741_s23 + $0x38] sm:$0xff] %vm2418_vm15, %v2417_v35 }
 0x3a4   : > { %2424 = vst.msk [vmem:[%s3741_s23 + $0x28] sm:$0xff] %vm2418_vm15, %v2415_v63 }
 0x3a5 PF: > { %s21_s19 = sadd.s32 1, %s3179_s19   ;;  %s3786_s17 = smov %s3175_s18 }
 0x3a6   : > { %p18_p5 = scmp.ge.s32.totalorder %s21_s19, 4   ;;  %s3787_s18 = smov %s3789_s20 }
 0x3a8   :  { %20 = sbr.rel (!%p18_p5) target bundleno = 2 (0x2), region = 115 }

</bundles_post_ra>
